<compile_context>
chip_gen: v7x
topology: tpu7x:2x2x1
jax: 0.10.0
libtpu: 0.0.40
codegen_flags: <defaults>
</compile_context>

<pallas_src>
import jax
import jax.numpy as jnp
import numpy as np
from jax.experimental import pallas as pl
from jax.experimental.pallas import tpu as pltpu


def _round_up(x, m):
    return ((x + m - 1) // m) * m


def _vmem_limit_bytes(default=64 * 1024 * 1024):
    """Generation-aware VMEM budget: ~3/4 of physical VMEM (128 MiB on
    v5e/v6e -> ~96 MiB, 64 MiB on v7x -> ~48 MiB).  Falls back to 64 MiB."""
    try:
        info = pltpu.get_tpu_info()
        cap = getattr(info, "vmem_capacity_bytes", None)
        if cap:
            return int(cap) * 3 // 4
    except Exception:
        pass
    return default


# ----------------------------- Pallas kernel --------------------------------
def _make_fine_merge_kernel(ww, d_f):
    def kernel(fwin_ref, fc_ref, wf_ref, wc_ref, bias_ref, out_ref):
        # fwin_ref: [tile_n, ww*d_f] bf16  flattened fine windows
        #                                  (window-major, channel-minor)
        # fc_ref:   [tile_n, d_c]    bf16  gathered coarse features
        # wf_ref:   [d_f, d_f]       bf16  fine half of merge_feat
        # wc_ref:   [d_c, d_f]       bf16  down_proj @ coarse-half (folded)
        # bias_ref: [1, d_f]         f32   folded bias
        # out_ref:  [tile_n, ww*d_f]
        # Per-match coarse term, shared by all ww window positions; the bias
        # broadcast is hoisted out of the per-window loop.
        t = jnp.dot(fc_ref[...], wc_ref[...],
                    preferred_element_type=jnp.float32) + bias_ref[...]
        wf = wf_ref[...]
        for w in range(ww):            # static unroll over the W*W positions
            lo = w * d_f               # static, lane-aligned at d_f=128
            f = jnp.dot(fwin_ref[:, lo:lo + d_f], wf,
                        preferred_element_type=jnp.float32)
            out_ref[:, lo:lo + d_f] = (f + t).astype(out_ref.dtype)
    return kernel


def fine_merge_pallas(feat_win, feat_c_sel, w_fine, w_coarse, bias, *, ww, d_f,
                      max_tile=512, bucket=True,
                      compute_dtype=jnp.bfloat16, out_dtype=jnp.float32):
    """feat_win: [n, ww*d_f], feat_c_sel: [n, d_c] -> [n, ww*d_f]."""
    n, wwc = feat_win.shape
    d_c = feat_c_sel.shape[1]
    assert wwc == ww * d_f

    # ---- row-tile sizing: step-first (bounded padding), even step count on
    #      multi-step grids, power-of-two bucketing to limit recompiles. -----
    n_eff = max(8, int(pl.next_power_of_2(int(n)))) if bucket else n
    steps = max(1, pl.cdiv(n_eff, max_tile))
    if steps > 1 and steps % 2 == 1:
        steps += 1     # even #steps -> both v7x TensorCores get equal work
    # TODO(synk): query the TensorCore count via pltpu.get_tpu_info and only
    # force multi-step grids on 2-TC chips (or use pltpu.CORE_PARALLEL); on a
    # 1-TC chip the extra grid step only costs ~0.35us.
    tile_n = _round_up(pl.cdiv(n_eff, steps), 8)
    n_pad = steps * tile_n

    if n_pad != n:
        feat_win = jnp.pad(feat_win, ((0, n_pad - n), (0, 0)))
        feat_c_sel = jnp.pad(feat_c_sel, ((0, n_pad - n), (0, 0)))

    fwin = feat_win.astype(compute_dtype)
    fc = feat_c_sel.astype(compute_dtype)
    wf = w_fine.astype(compute_dtype)
    wc = w_coarse.astype(compute_dtype)
    b = bias.astype(jnp.float32).reshape(1, d_f)

    # Constants (wf/wc/bias) total <100 KB even at production d_f=128/d_c=256,
    # so default double-buffering is harmless; their grid-invariant index_map
    # means they are only DMA'd once.
    out = pl.pallas_call(
        _make_fine_merge_kernel(ww, d_f),
        out_shape=jax.ShapeDtypeStruct((n_pad, wwc), out_dtype),
        grid=(steps,),
        in_specs=[
            pl.BlockSpec((tile_n, wwc), lambda i: (i, 0)),
            pl.BlockSpec((tile_n, d_c), lambda i: (i, 0)),
            pl.BlockSpec((d_f, d_f), lambda i: (0, 0)),
            pl.BlockSpec((d_c, d_f), lambda i: (0, 0)),
            pl.BlockSpec((1, d_f), lambda i: (0, 0)),
        ],
        out_specs=pl.BlockSpec((tile_n, wwc), lambda i: (i, 0)),
        compiler_params=pltpu.CompilerParams(
            dimension_semantics=("parallel",),
            vmem_limit_bytes=_vmem_limit_bytes()),
    )(fwin, fc, wf, wc, b)
    return out[:n]


# ----------------------------- JAX glue --------------------------------------
def gather_windows(feat_f, b_ids, l_ids, W, stride):
    """Gather the WxW fine-feature window of each match (b, l) directly,
    matching F.unfold(kernel=(W,W), stride=stride, padding=W//2) followed by
    rearrange 'n (c ww) l -> n l ww c' and the [b, l] row selection, without
    ever materializing the 25x-expanded unfold tensor.  feat_f: [N, C, H, W]
    (NCHW) -> [M, W*W, C]."""
    N, C, Hf, Wf = feat_f.shape
    pad = W // 2
    x = jnp.transpose(feat_f, (0, 2, 3, 1))                     # NHWC once
    x = jnp.pad(x, ((0, 0), (pad, pad), (pad, pad), (0, 0)))
    out_w = (Wf + 2 * pad - W) // stride + 1
    oh = l_ids // out_w
    ow = l_ids % out_w
    rows = oh[:, None] * stride + jnp.arange(W)[None, :]        # [M, W]
    cols = ow[:, None] * stride + jnp.arange(W)[None, :]        # [M, W]
    # advanced indexing -> [M, W, W, C] with ww ordered (kh, kw)
    win = x[b_ids[:, None, None], rows[:, :, None], cols[:, None, :], :]
    # TODO(synk): at production scale, do this gather inside the kernel
    # (PrefetchScalarGridSpec with b/l ids + feat_f in pl.ANY + make_async_copy)
    # to also skip this XLA gather's HBM round-trip; needs halo handling for
    # the zero-padding at the image border.
    return win.reshape(b_ids.shape[0], W * W, C)


class FinePreprocessPallas:
    def __init__(self, config, key, compute_dtype=jnp.bfloat16,
                 out_dtype=jnp.float32):
        self.config = config
        self.cat_c_feat = config['fine_concat_coarse_feat']
        self.W = config['fine_window_size']
        d_model_c = config['coarse']['d_model']
        d_model_f = config['fine']['d_model']
        self.d_model_f = d_model_f
        self.compute_dtype = compute_dtype
        self.out_dtype = out_dtype
        if self.cat_c_feat:
            k1, k2, k3, k4 = jax.random.split(key, 4)
            # kaiming_normal_(fan_out, relu): std = sqrt(2 / out_features)
            self.wd = jax.random.normal(k1, (d_model_c, d_model_f),
                                        jnp.float32) * np.sqrt(2.0 / d_model_f)
            self.bd = jax.random.uniform(k2, (d_model_f,), jnp.float32,
                                         -0.1, 0.1)
            self.wm = jax.random.normal(k3, (2 * d_model_f, d_model_f),
                                        jnp.float32) * np.sqrt(2.0 / d_model_f)
            self.bm = jax.random.uniform(k4, (d_model_f,), jnp.float32,
                                         -0.1, 0.1)
            self._fold_weights()

    def _fold_weights(self):
        """Offline fold of down_proj into the coarse half of merge_feat:
        out = fwin @ wm1 + fc @ (wd @ wm2) + (bd @ wm2 + bm)."""
        d_f = self.d_model_f
        wm1 = self.wm[:d_f]          # fine-window half of merge_feat, [df, df]
        wm2 = self.wm[d_f:]          # coarse half, [df, df]
        hi = jax.lax.Precision.HIGHEST
        self._w_fine = wm1                                         # [df, df]
        self._w_coarse = jnp.dot(self.wd, wm2, precision=hi)       # [dc, df]
        self._bias = jnp.dot(self.bd, wm2, precision=hi) + self.bm # [df]

    def __call__(self, feat_f0, feat_f1, feat_c0, feat_c1, data):
        W = self.W
        ww = W * W
        if self.config.get('onnx', False):
            # TODO(synk): ONNX-export layout branch of the reference module is
            # not implemented; only the standard (non-onnx) path is supported.
            stride = self.config['resolution'][0] // self.config['resolution'][1]
        else:
            stride = data['hw0_f'][0] // data['hw0_c'][0]
        data['W'] = W

        if data['b_ids'].shape[0] == 0:
            feat0 = jnp.empty((0, ww, self.d_model_f), jnp.float32)
            feat1 = jnp.empty((0, ww, self.d_model_f), jnp.float32)
            return feat0, feat1

        b, i, j = data['b_ids'], data['i_ids'], data['j_ids']
        M = b.shape[0]
        C = feat_f0.shape[1]
        feat0 = gather_windows(feat_f0, b, i, W, stride)     # [M, ww, C]
        feat1 = gather_windows(feat_f1, b, j, W, stride)     # [M, ww, C]

        if self.cat_c_feat:
            feat_c_sel = jnp.concatenate([feat_c0[b, i], feat_c1[b, j]], 0)
            feat_win = jnp.concatenate([feat0, feat1], 0).reshape(2 * M, ww * C)
            out = fine_merge_pallas(
                feat_win, feat_c_sel, self._w_fine, self._w_coarse, self._bias,
                ww=ww, d_f=self.d_model_f,
                compute_dtype=self.compute_dtype, out_dtype=self.out_dtype)
            out = out.reshape(2 * M, ww, self.d_model_f)
            feat0, feat1 = jnp.split(out, 2, axis=0)
            return feat0, feat1
        return feat0, feat1


# --------------------------- pure-numpy reference -----------------------------
def _np_unfold_gather(feat, b_ids, l_ids, W, stride):
    """Torch F.unfold + rearrange + [b, l] selection, in plain numpy."""
    feat = np.asarray(feat, np.float32)
    N, C, H, Wd = feat.shape
    pad = W // 2
    xp = np.pad(feat, ((0, 0), (0, 0), (pad, pad), (pad, pad)))
    out_w = (Wd + 2 * pad - W) // stride + 1
    M = b_ids.shape[0]
    out = np.zeros((M, W * W, C), np.float32)
    for m in range(M):
        bb, ll = int(b_ids[m]), int(l_ids[m])
        oh, ow = ll // out_w, ll % out_w
        win = xp[bb, :, oh * stride:oh * stride + W, ow * stride:ow * stride + W]
        out[m] = win.reshape(C, W * W).T          # ww = kh*W + kw, then [ww, C]
    return out


def _reference_merge(f0win, f1win, fc0, fc1, wd, bd, wm, bm):
    f0win, f1win, fc0, fc1, wd, bd, wm, bm = (
        np.asarray(a, dtype=np.float32)
        for a in (f0win, f1win, fc0, fc1, wd, bd, wm, bm))
    c = np.concatenate([fc0, fc1], 0) @ wd + bd
    c = np.repeat(c[:, None, :], f0win.shape[1], axis=1)
    fw = np.concatenate([f0win, f1win], 0)
    out = np.concatenate([fw, c], -1) @ wm + bm
    return np.split(out, 2, axis=0)


if __name__ == "__main__":
    key = jax.random.PRNGKey(0)
    config = {
        'fine_concat_coarse_feat': True,
        'fine_window_size': 5,
        'coarse': {'d_model': 32},
        'fine': {'d_model': 16},
        'onnx': False,
        'resolution': (8, 2),
    }
    N, Hf, Wf = 2, 16, 16
    Hc, Wc = 4, 4
    d_c, d_f = 32, 16
    M = 8

    ks = jax.random.split(key, 8)
    feat_f0 = jax.random.normal(ks[0], (N, d_f, Hf, Wf), jnp.float32)
    feat_f1 = jax.random.normal(ks[1], (N, d_f, Hf, Wf), jnp.float32)
    feat_c0 = jax.random.normal(ks[2], (N, Hc * Wc, d_c), jnp.float32)
    feat_c1 = jax.random.normal(ks[3], (N, Hc * Wc, d_c), jnp.float32)
    b_ids = jax.random.randint(ks[4], (M,), 0, N)
    i_ids = jax.random.randint(ks[5], (M,), 0, Hc * Wc)
    j_ids = jax.random.randint(ks[6], (M,), 0, Hc * Wc)
    data = {'hw0_f': (Hf, Wf), 'hw0_c': (Hc, Wc),
            'b_ids': b_ids, 'i_ids': i_ids, 'j_ids': j_ids}

    module = FinePreprocessPallas(config, ks[7])
    f0, f1 = module(feat_f0, feat_f1, feat_c0, feat_c1, data)
    jax.block_until_ready((f0, f1))

    # correctness check against a pure-f32 numpy reference of the torch path
    W = config['fine_window_size']
    WW = W * W
    stride = Hf // Hc
    b_np, i_np, j_np = (np.asarray(a) for a in (b_ids, i_ids, j_ids))
    r0win = _np_unfold_gather(feat_f0, b_np, i_np, W, stride)
    r1win = _np_unfold_gather(feat_f1, b_np, j_np, W, stride)
    r0, r1 = _reference_merge(
        r0win, r1win,
        np.asarray(feat_c0)[b_np, i_np], np.asarray(feat_c1)[b_np, j_np],
        module.wd, module.bd, module.wm, module.bm)
    assert f0.shape == (M, WW, d_f) and f1.shape == (M, WW, d_f)
    # bf16 matmul operands (f32 accumulation) -> loosened tolerance vs f32 ref
    np.testing.assert_allclose(np.asarray(f0), r0, rtol=5e-2, atol=5e-2)
    np.testing.assert_allclose(np.asarray(f1), r1, rtol=5e-2, atol=5e-2)

    print("KERNEL_OK")
</pallas_src>

<mosaic_0001>
module attributes {stable_mosaic.version = 11 : i64} {
  func.func @kernel(%arg0: i32, %arg1: memref<16x400xbf16, #tpu.memory_space<vmem>>, %arg2: memref<16x32xbf16, #tpu.memory_space<vmem>>, %arg3: memref<16x16xbf16, #tpu.memory_space<vmem>>, %arg4: memref<32x16xbf16, #tpu.memory_space<vmem>>, %arg5: memref<1x16xf32, #tpu.memory_space<vmem>>, %arg6: memref<16x400xf32, #tpu.memory_space<vmem>>) attributes {dimension_semantics = [#tpu.dimension_semantics<parallel>], iteration_bounds = array<i64: 1>, scalar_prefetch = 0 : i64, scratch_operands = 0 : i64, tpu.core_type = #tpu.core_type<tc>, window_params = [{transform_indices = @transform_0, window_bounds = array<i64: 16, 400>}, {transform_indices = @transform_1, window_bounds = array<i64: 16, 32>}, {pipeline_mode = #tpu.pipeline_mode<synchronous>, transform_indices = @transform_2, window_bounds = array<i64: 16, 16>}, {pipeline_mode = #tpu.pipeline_mode<synchronous>, transform_indices = @transform_3, window_bounds = array<i64: 32, 16>}, {pipeline_mode = #tpu.pipeline_mode<synchronous>, transform_indices = @transform_4, window_bounds = array<i64: 1, 16>}, {transform_indices = @transform_5, window_bounds = array<i64: 16, 400>}]} {
    %c0 = arith.constant 0 : index
    %c0_0 = arith.constant 0 : index
    %0 = vector.load %arg2[%c0, %c0_0] : memref<16x32xbf16, #tpu.memory_space<vmem>>, vector<16x32xbf16>
    %c0_1 = arith.constant 0 : index
    %c0_2 = arith.constant 0 : index
    %1 = vector.load %arg4[%c0_1, %c0_2] : memref<32x16xbf16, #tpu.memory_space<vmem>>, vector<32x16xbf16>
    %cst = arith.constant dense<0.000000e+00> : vector<16x16xf32>
    %2 = tpu.matmul %0, %1, %cst {dimension_numbers = #tpu.dot_dimension_numbers<[1], [0], [0], [1], [0, 0, 1, 1], [], []>} : vector<16x32xbf16>, vector<32x16xbf16>, vector<16x16xf32> -> vector<16x16xf32>
    %c0_3 = arith.constant 0 : index
    %c0_4 = arith.constant 0 : index
    %3 = vector.load %arg5[%c0_3, %c0_4] : memref<1x16xf32, #tpu.memory_space<vmem>>, vector<1x16xf32>
    %4 = vector.broadcast %3 : vector<1x16xf32> to vector<16x16xf32>
    %5 = arith.addf %2, %4 : vector<16x16xf32>
    %c0_5 = arith.constant 0 : index
    %c0_6 = arith.constant 0 : index
    %6 = vector.load %arg3[%c0_5, %c0_6] : memref<16x16xbf16, #tpu.memory_space<vmem>>, vector<16x16xbf16>
    %c0_7 = arith.constant 0 : index
    %c0_8 = arith.constant 0 : index
    %7 = vector.load %arg1[%c0_7, %c0_8] : memref<16x400xbf16, #tpu.memory_space<vmem>>, vector<16x16xbf16>
    %cst_9 = arith.constant dense<0.000000e+00> : vector<16x16xf32>
    %8 = tpu.matmul %7, %6, %cst_9 {dimension_numbers = #tpu.dot_dimension_numbers<[1], [0], [0], [1], [0, 0, 1, 1], [], []>} : vector<16x16xbf16>, vector<16x16xbf16>, vector<16x16xf32> -> vector<16x16xf32>
    %9 = arith.addf %8, %5 : vector<16x16xf32>
    %c0_10 = arith.constant 0 : index
    %c0_11 = arith.constant 0 : index
    %10 = vector.load %arg6[%c0_10, %c0_11] : memref<16x400xf32, #tpu.memory_space<vmem>>, vector<16x16xf32>
    tpu.vector_store %arg6[%c0_10, %c0_11], %9 {strides = array<i32>} : memref<16x400xf32, #tpu.memory_space<vmem>>, vector<16x16xf32>,
    %c0_12 = arith.constant 0 : index
    %c16 = arith.constant 16 : index
    %11 = vector.load %arg1[%c0_12, %c16] : memref<16x400xbf16, #tpu.memory_space<vmem>>, vector<16x16xbf16>
    %cst_13 = arith.constant dense<0.000000e+00> : vector<16x16xf32>
    %12 = tpu.matmul %11, %6, %cst_13 {dimension_numbers = #tpu.dot_dimension_numbers<[1], [0], [0], [1], [0, 0, 1, 1], [], []>} : vector<16x16xbf16>, vector<16x16xbf16>, vector<16x16xf32> -> vector<16x16xf32>
    %13 = arith.addf %12, %5 : vector<16x16xf32>
    %c0_14 = arith.constant 0 : index
    %c16_15 = arith.constant 16 : index
    %14 = vector.load %arg6[%c0_14, %c16_15] : memref<16x400xf32, #tpu.memory_space<vmem>>, vector<16x16xf32>
    tpu.vector_store %arg6[%c0_14, %c16_15], %13 {strides = array<i32>} : memref<16x400xf32, #tpu.memory_space<vmem>>, vector<16x16xf32>,
    %c0_16 = arith.constant 0 : index
    %c32 = arith.constant 32 : index
    %15 = vector.load %arg1[%c0_16, %c32] : memref<16x400xbf16, #tpu.memory_space<vmem>>, vector<16x16xbf16>
    %cst_17 = arith.constant dense<0.000000e+00> : vector<16x16xf32>
    %16 = tpu.matmul %15, %6, %cst_17 {dimension_numbers = #tpu.dot_dimension_numbers<[1], [0], [0], [1], [0, 0, 1, 1], [], []>} : vector<16x16xbf16>, vector<16x16xbf16>, vector<16x16xf32> -> vector<16x16xf32>
    %17 = arith.addf %16, %5 : vector<16x16xf32>
    %c0_18 = arith.constant 0 : index
    %c32_19 = arith.constant 32 : index
    %18 = vector.load %arg6[%c0_18, %c32_19] : memref<16x400xf32, #tpu.memory_space<vmem>>, vector<16x16xf32>
    tpu.vector_store %arg6[%c0_18, %c32_19], %17 {strides = array<i32>} : memref<16x400xf32, #tpu.memory_space<vmem>>, vector<16x16xf32>,
    %c0_20 = arith.constant 0 : index
    %c48 = arith.constant 48 : index
    %19 = vector.load %arg1[%c0_20, %c48] : memref<16x400xbf16, #tpu.memory_space<vmem>>, vector<16x16xbf16>
    %cst_21 = arith.constant dense<0.000000e+00> : vector<16x16xf32>
    %20 = tpu.matmul %19, %6, %cst_21 {dimension_numbers = #tpu.dot_dimension_numbers<[1], [0], [0], [1], [0, 0, 1, 1], [], []>} : vector<16x16xbf16>, vector<16x16xbf16>, vector<16x16xf32> -> vector<16x16xf32>
    %21 = arith.addf %20, %5 : vector<16x16xf32>
    %c0_22 = arith.constant 0 : index
    %c48_23 = arith.constant 48 : index
    %22 = vector.load %arg6[%c0_22, %c48_23] : memref<16x400xf32, #tpu.memory_space<vmem>>, vector<16x16xf32>
    tpu.vector_store %arg6[%c0_22, %c48_23], %21 {strides = array<i32>} : memref<16x400xf32, #tpu.memory_space<vmem>>, vector<16x16xf32>,
    %c0_24 = arith.constant 0 : index
    %c64 = arith.constant 64 : index
    %23 = vector.load %arg1[%c0_24, %c64] : memref<16x400xbf16, #tpu.memory_space<vmem>>, vector<16x16xbf16>
    %cst_25 = arith.constant dense<0.000000e+00> : vector<16x16xf32>
    %24 = tpu.matmul %23, %6, %cst_25 {dimension_numbers = #tpu.dot_dimension_numbers<[1], [0], [0], [1], [0, 0, 1, 1], [], []>} : vector<16x16xbf16>, vector<16x16xbf16>, vector<16x16xf32> -> vector<16x16xf32>
    %25 = arith.addf %24, %5 : vector<16x16xf32>
    %c0_26 = arith.constant 0 : index
    %c64_27 = arith.constant 64 : index
    %26 = vector.load %arg6[%c0_26, %c64_27] : memref<16x400xf32, #tpu.memory_space<vmem>>, vector<16x16xf32>
    tpu.vector_store %arg6[%c0_26, %c64_27], %25 {strides = array<i32>} : memref<16x400xf32, #tpu.memory_space<vmem>>, vector<16x16xf32>,
    %c0_28 = arith.constant 0 : index
    %c80 = arith.constant 80 : index
    %27 = vector.load %arg1[%c0_28, %c80] : memref<16x400xbf16, #tpu.memory_space<vmem>>, vector<16x16xbf16>
    %cst_29 = arith.constant dense<0.000000e+00> : vector<16x16xf32>
    %28 = tpu.matmul %27, %6, %cst_29 {dimension_numbers = #tpu.dot_dimension_numbers<[1], [0], [0], [1], [0, 0, 1, 1], [], []>} : vector<16x16xbf16>, vector<16x16xbf16>, vector<16x16xf32> -> vector<16x16xf32>
    %29 = arith.addf %28, %5 : vector<16x16xf32>
    %c0_30 = arith.constant 0 : index
    %c80_31 = arith.constant 80 : index
    %30 = vector.load %arg6[%c0_30, %c80_31] : memref<16x400xf32, #tpu.memory_space<vmem>>, vector<16x16xf32>
    tpu.vector_store %arg6[%c0_30, %c80_31], %29 {strides = array<i32>} : memref<16x400xf32, #tpu.memory_space<vmem>>, vector<16x16xf32>,
    %c0_32 = arith.constant 0 : index
    %c96 = arith.constant 96 : index
    %31 = vector.load %arg1[%c0_32, %c96] : memref<16x400xbf16, #tpu.memory_space<vmem>>, vector<16x16xbf16>
    %cst_33 = arith.constant dense<0.000000e+00> : vector<16x16xf32>
    %32 = tpu.matmul %31, %6, %cst_33 {dimension_numbers = #tpu.dot_dimension_numbers<[1], [0], [0], [1], [0, 0, 1, 1], [], []>} : vector<16x16xbf16>, vector<16x16xbf16>, vector<16x16xf32> -> vector<16x16xf32>
    %33 = arith.addf %32, %5 : vector<16x16xf32>
    %c0_34 = arith.constant 0 : index
    %c96_35 = arith.constant 96 : index
    %34 = vector.load %arg6[%c0_34, %c96_35] : memref<16x400xf32, #tpu.memory_space<vmem>>, vector<16x16xf32>
    tpu.vector_store %arg6[%c0_34, %c96_35], %33 {strides = array<i32>} : memref<16x400xf32, #tpu.memory_space<vmem>>, vector<16x16xf32>,
    %c0_36 = arith.constant 0 : index
    %c112 = arith.constant 112 : index
    %35 = vector.load %arg1[%c0_36, %c112] : memref<16x400xbf16, #tpu.memory_space<vmem>>, vector<16x16xbf16>
    %cst_37 = arith.constant dense<0.000000e+00> : vector<16x16xf32>
    %36 = tpu.matmul %35, %6, %cst_37 {dimension_numbers = #tpu.dot_dimension_numbers<[1], [0], [0], [1], [0, 0, 1, 1], [], []>} : vector<16x16xbf16>, vector<16x16xbf16>, vector<16x16xf32> -> vector<16x16xf32>
    %37 = arith.addf %36, %5 : vector<16x16xf32>
    %c0_38 = arith.constant 0 : index
    %c112_39 = arith.constant 112 : index
    %38 = vector.load %arg6[%c0_38, %c112_39] : memref<16x400xf32, #tpu.memory_space<vmem>>, vector<16x16xf32>
    tpu.vector_store %arg6[%c0_38, %c112_39], %37 {strides = array<i32>} : memref<16x400xf32, #tpu.memory_space<vmem>>, vector<16x16xf32>,
    %c0_40 = arith.constant 0 : index
    %c128 = arith.constant 128 : index
    %39 = vector.load %arg1[%c0_40, %c128] : memref<16x400xbf16, #tpu.memory_space<vmem>>, vector<16x16xbf16>
    %cst_41 = arith.constant dense<0.000000e+00> : vector<16x16xf32>
    %40 = tpu.matmul %39, %6, %cst_41 {dimension_numbers = #tpu.dot_dimension_numbers<[1], [0], [0], [1], [0, 0, 1, 1], [], []>} : vector<16x16xbf16>, vector<16x16xbf16>, vector<16x16xf32> -> vector<16x16xf32>
    %41 = arith.addf %40, %5 : vector<16x16xf32>
    %c0_42 = arith.constant 0 : index
    %c128_43 = arith.constant 128 : index
    %42 = vector.load %arg6[%c0_42, %c128_43] : memref<16x400xf32, #tpu.memory_space<vmem>>, vector<16x16xf32>
    tpu.vector_store %arg6[%c0_42, %c128_43], %41 {strides = array<i32>} : memref<16x400xf32, #tpu.memory_space<vmem>>, vector<16x16xf32>,
    %c0_44 = arith.constant 0 : index
    %c144 = arith.constant 144 : index
    %43 = vector.load %arg1[%c0_44, %c144] : memref<16x400xbf16, #tpu.memory_space<vmem>>, vector<16x16xbf16>
    %cst_45 = arith.constant dense<0.000000e+00> : vector<16x16xf32>
    %44 = tpu.matmul %43, %6, %cst_45 {dimension_numbers = #tpu.dot_dimension_numbers<[1], [0], [0], [1], [0, 0, 1, 1], [], []>} : vector<16x16xbf16>, vector<16x16xbf16>, vector<16x16xf32> -> vector<16x16xf32>
    %45 = arith.addf %44, %5 : vector<16x16xf32>
    %c0_46 = arith.constant 0 : index
    %c144_47 = arith.constant 144 : index
    %46 = vector.load %arg6[%c0_46, %c144_47] : memref<16x400xf32, #tpu.memory_space<vmem>>, vector<16x16xf32>
    tpu.vector_store %arg6[%c0_46, %c144_47], %45 {strides = array<i32>} : memref<16x400xf32, #tpu.memory_space<vmem>>, vector<16x16xf32>,
    %c0_48 = arith.constant 0 : index
    %c160 = arith.constant 160 : index
    %47 = vector.load %arg1[%c0_48, %c160] : memref<16x400xbf16, #tpu.memory_space<vmem>>, vector<16x16xbf16>
    %cst_49 = arith.constant dense<0.000000e+00> : vector<16x16xf32>
    %48 = tpu.matmul %47, %6, %cst_49 {dimension_numbers = #tpu.dot_dimension_numbers<[1], [0], [0], [1], [0, 0, 1, 1], [], []>} : vector<16x16xbf16>, vector<16x16xbf16>, vector<16x16xf32> -> vector<16x16xf32>
    %49 = arith.addf %48, %5 : vector<16x16xf32>
    %c0_50 = arith.constant 0 : index
    %c160_51 = arith.constant 160 : index
    %50 = vector.load %arg6[%c0_50, %c160_51] : memref<16x400xf32, #tpu.memory_space<vmem>>, vector<16x16xf32>
    tpu.vector_store %arg6[%c0_50, %c160_51], %49 {strides = array<i32>} : memref<16x400xf32, #tpu.memory_space<vmem>>, vector<16x16xf32>,
    %c0_52 = arith.constant 0 : index
    %c176 = arith.constant 176 : index
    %51 = vector.load %arg1[%c0_52, %c176] : memref<16x400xbf16, #tpu.memory_space<vmem>>, vector<16x16xbf16>
    %cst_53 = arith.constant dense<0.000000e+00> : vector<16x16xf32>
    %52 = tpu.matmul %51, %6, %cst_53 {dimension_numbers = #tpu.dot_dimension_numbers<[1], [0], [0], [1], [0, 0, 1, 1], [], []>} : vector<16x16xbf16>, vector<16x16xbf16>, vector<16x16xf32> -> vector<16x16xf32>
    %53 = arith.addf %52, %5 : vector<16x16xf32>
    %c0_54 = arith.constant 0 : index
    %c176_55 = arith.constant 176 : index
    %54 = vector.load %arg6[%c0_54, %c176_55] : memref<16x400xf32, #tpu.memory_space<vmem>>, vector<16x16xf32>
    tpu.vector_store %arg6[%c0_54, %c176_55], %53 {strides = array<i32>} : memref<16x400xf32, #tpu.memory_space<vmem>>, vector<16x16xf32>,
    %c0_56 = arith.constant 0 : index
    %c192 = arith.constant 192 : index
    %55 = vector.load %arg1[%c0_56, %c192] : memref<16x400xbf16, #tpu.memory_space<vmem>>, vector<16x16xbf16>
    %cst_57 = arith.constant dense<0.000000e+00> : vector<16x16xf32>
    %56 = tpu.matmul %55, %6, %cst_57 {dimension_numbers = #tpu.dot_dimension_numbers<[1], [0], [0], [1], [0, 0, 1, 1], [], []>} : vector<16x16xbf16>, vector<16x16xbf16>, vector<16x16xf32> -> vector<16x16xf32>
    %57 = arith.addf %56, %5 : vector<16x16xf32>
    %c0_58 = arith.constant 0 : index
    %c192_59 = arith.constant 192 : index
    %58 = vector.load %arg6[%c0_58, %c192_59] : memref<16x400xf32, #tpu.memory_space<vmem>>, vector<16x16xf32>
    tpu.vector_store %arg6[%c0_58, %c192_59], %57 {strides = array<i32>} : memref<16x400xf32, #tpu.memory_space<vmem>>, vector<16x16xf32>,
    %c0_60 = arith.constant 0 : index
    %c208 = arith.constant 208 : index
    %59 = vector.load %arg1[%c0_60, %c208] : memref<16x400xbf16, #tpu.memory_space<vmem>>, vector<16x16xbf16>
    %cst_61 = arith.constant dense<0.000000e+00> : vector<16x16xf32>
    %60 = tpu.matmul %59, %6, %cst_61 {dimension_numbers = #tpu.dot_dimension_numbers<[1], [0], [0], [1], [0, 0, 1, 1], [], []>} : vector<16x16xbf16>, vector<16x16xbf16>, vector<16x16xf32> -> vector<16x16xf32>
    %61 = arith.addf %60, %5 : vector<16x16xf32>
    %c0_62 = arith.constant 0 : index
    %c208_63 = arith.constant 208 : index
    %62 = vector.load %arg6[%c0_62, %c208_63] : memref<16x400xf32, #tpu.memory_space<vmem>>, vector<16x16xf32>
    tpu.vector_store %arg6[%c0_62, %c208_63], %61 {strides = array<i32>} : memref<16x400xf32, #tpu.memory_space<vmem>>, vector<16x16xf32>,
    %c0_64 = arith.constant 0 : index
    %c224 = arith.constant 224 : index
    %63 = vector.load %arg1[%c0_64, %c224] : memref<16x400xbf16, #tpu.memory_space<vmem>>, vector<16x16xbf16>
    %cst_65 = arith.constant dense<0.000000e+00> : vector<16x16xf32>
    %64 = tpu.matmul %63, %6, %cst_65 {dimension_numbers = #tpu.dot_dimension_numbers<[1], [0], [0], [1], [0, 0, 1, 1], [], []>} : vector<16x16xbf16>, vector<16x16xbf16>, vector<16x16xf32> -> vector<16x16xf32>
    %65 = arith.addf %64, %5 : vector<16x16xf32>
    %c0_66 = arith.constant 0 : index
    %c224_67 = arith.constant 224 : index
    %66 = vector.load %arg6[%c0_66, %c224_67] : memref<16x400xf32, #tpu.memory_space<vmem>>, vector<16x16xf32>
    tpu.vector_store %arg6[%c0_66, %c224_67], %65 {strides = array<i32>} : memref<16x400xf32, #tpu.memory_space<vmem>>, vector<16x16xf32>,
    %c0_68 = arith.constant 0 : index
    %c240 = arith.constant 240 : index
    %67 = vector.load %arg1[%c0_68, %c240] : memref<16x400xbf16, #tpu.memory_space<vmem>>, vector<16x16xbf16>
    %cst_69 = arith.constant dense<0.000000e+00> : vector<16x16xf32>
    %68 = tpu.matmul %67, %6, %cst_69 {dimension_numbers = #tpu.dot_dimension_numbers<[1], [0], [0], [1], [0, 0, 1, 1], [], []>} : vector<16x16xbf16>, vector<16x16xbf16>, vector<16x16xf32> -> vector<16x16xf32>
    %69 = arith.addf %68, %5 : vector<16x16xf32>
    %c0_70 = arith.constant 0 : index
    %c240_71 = arith.constant 240 : index
    %70 = vector.load %arg6[%c0_70, %c240_71] : memref<16x400xf32, #tpu.memory_space<vmem>>, vector<16x16xf32>
    tpu.vector_store %arg6[%c0_70, %c240_71], %69 {strides = array<i32>} : memref<16x400xf32, #tpu.memory_space<vmem>>, vector<16x16xf32>,
    %c0_72 = arith.constant 0 : index
    %c256 = arith.constant 256 : index
    %71 = vector.load %arg1[%c0_72, %c256] : memref<16x400xbf16, #tpu.memory_space<vmem>>, vector<16x16xbf16>
    %cst_73 = arith.constant dense<0.000000e+00> : vector<16x16xf32>
    %72 = tpu.matmul %71, %6, %cst_73 {dimension_numbers = #tpu.dot_dimension_numbers<[1], [0], [0], [1], [0, 0, 1, 1], [], []>} : vector<16x16xbf16>, vector<16x16xbf16>, vector<16x16xf32> -> vector<16x16xf32>
    %73 = arith.addf %72, %5 : vector<16x16xf32>
    %c0_74 = arith.constant 0 : index
    %c256_75 = arith.constant 256 : index
    %74 = vector.load %arg6[%c0_74, %c256_75] : memref<16x400xf32, #tpu.memory_space<vmem>>, vector<16x16xf32>
    tpu.vector_store %arg6[%c0_74, %c256_75], %73 {strides = array<i32>} : memref<16x400xf32, #tpu.memory_space<vmem>>, vector<16x16xf32>,
    %c0_76 = arith.constant 0 : index
    %c272 = arith.constant 272 : index
    %75 = vector.load %arg1[%c0_76, %c272] : memref<16x400xbf16, #tpu.memory_space<vmem>>, vector<16x16xbf16>
    %cst_77 = arith.constant dense<0.000000e+00> : vector<16x16xf32>
    %76 = tpu.matmul %75, %6, %cst_77 {dimension_numbers = #tpu.dot_dimension_numbers<[1], [0], [0], [1], [0, 0, 1, 1], [], []>} : vector<16x16xbf16>, vector<16x16xbf16>, vector<16x16xf32> -> vector<16x16xf32>
    %77 = arith.addf %76, %5 : vector<16x16xf32>
    %c0_78 = arith.constant 0 : index
    %c272_79 = arith.constant 272 : index
    %78 = vector.load %arg6[%c0_78, %c272_79] : memref<16x400xf32, #tpu.memory_space<vmem>>, vector<16x16xf32>
    tpu.vector_store %arg6[%c0_78, %c272_79], %77 {strides = array<i32>} : memref<16x400xf32, #tpu.memory_space<vmem>>, vector<16x16xf32>,
    %c0_80 = arith.constant 0 : index
    %c288 = arith.constant 288 : index
    %79 = vector.load %arg1[%c0_80, %c288] : memref<16x400xbf16, #tpu.memory_space<vmem>>, vector<16x16xbf16>
    %cst_81 = arith.constant dense<0.000000e+00> : vector<16x16xf32>
    %80 = tpu.matmul %79, %6, %cst_81 {dimension_numbers = #tpu.dot_dimension_numbers<[1], [0], [0], [1], [0, 0, 1, 1], [], []>} : vector<16x16xbf16>, vector<16x16xbf16>, vector<16x16xf32> -> vector<16x16xf32>
    %81 = arith.addf %80, %5 : vector<16x16xf32>
    %c0_82 = arith.constant 0 : index
    %c288_83 = arith.constant 288 : index
    %82 = vector.load %arg6[%c0_82, %c288_83] : memref<16x400xf32, #tpu.memory_space<vmem>>, vector<16x16xf32>
    tpu.vector_store %arg6[%c0_82, %c288_83], %81 {strides = array<i32>} : memref<16x400xf32, #tpu.memory_space<vmem>>, vector<16x16xf32>,
    %c0_84 = arith.constant 0 : index
    %c304 = arith.constant 304 : index
    %83 = vector.load %arg1[%c0_84, %c304] : memref<16x400xbf16, #tpu.memory_space<vmem>>, vector<16x16xbf16>
    %cst_85 = arith.constant dense<0.000000e+00> : vector<16x16xf32>
    %84 = tpu.matmul %83, %6, %cst_85 {dimension_numbers = #tpu.dot_dimension_numbers<[1], [0], [0], [1], [0, 0, 1, 1], [], []>} : vector<16x16xbf16>, vector<16x16xbf16>, vector<16x16xf32> -> vector<16x16xf32>
    %85 = arith.addf %84, %5 : vector<16x16xf32>
    %c0_86 = arith.constant 0 : index
    %c304_87 = arith.constant 304 : index
    %86 = vector.load %arg6[%c0_86, %c304_87] : memref<16x400xf32, #tpu.memory_space<vmem>>, vector<16x16xf32>
    tpu.vector_store %arg6[%c0_86, %c304_87], %85 {strides = array<i32>} : memref<16x400xf32, #tpu.memory_space<vmem>>, vector<16x16xf32>,
    %c0_88 = arith.constant 0 : index
    %c320 = arith.constant 320 : index
    %87 = vector.load %arg1[%c0_88, %c320] : memref<16x400xbf16, #tpu.memory_space<vmem>>, vector<16x16xbf16>
    %cst_89 = arith.constant dense<0.000000e+00> : vector<16x16xf32>
    %88 = tpu.matmul %87, %6, %cst_89 {dimension_numbers = #tpu.dot_dimension_numbers<[1], [0], [0], [1], [0, 0, 1, 1], [], []>} : vector<16x16xbf16>, vector<16x16xbf16>, vector<16x16xf32> -> vector<16x16xf32>
    %89 = arith.addf %88, %5 : vector<16x16xf32>
    %c0_90 = arith.constant 0 : index
    %c320_91 = arith.constant 320 : index
    %90 = vector.load %arg6[%c0_90, %c320_91] : memref<16x400xf32, #tpu.memory_space<vmem>>, vector<16x16xf32>
    tpu.vector_store %arg6[%c0_90, %c320_91], %89 {strides = array<i32>} : memref<16x400xf32, #tpu.memory_space<vmem>>, vector<16x16xf32>,
    %c0_92 = arith.constant 0 : index
    %c336 = arith.constant 336 : index
    %91 = vector.load %arg1[%c0_92, %c336] : memref<16x400xbf16, #tpu.memory_space<vmem>>, vector<16x16xbf16>
    %cst_93 = arith.constant dense<0.000000e+00> : vector<16x16xf32>
    %92 = tpu.matmul %91, %6, %cst_93 {dimension_numbers = #tpu.dot_dimension_numbers<[1], [0], [0], [1], [0, 0, 1, 1], [], []>} : vector<16x16xbf16>, vector<16x16xbf16>, vector<16x16xf32> -> vector<16x16xf32>
    %93 = arith.addf %92, %5 : vector<16x16xf32>
    %c0_94 = arith.constant 0 : index
    %c336_95 = arith.constant 336 : index
    %94 = vector.load %arg6[%c0_94, %c336_95] : memref<16x400xf32, #tpu.memory_space<vmem>>, vector<16x16xf32>
    tpu.vector_store %arg6[%c0_94, %c336_95], %93 {strides = array<i32>} : memref<16x400xf32, #tpu.memory_space<vmem>>, vector<16x16xf32>,
    %c0_96 = arith.constant 0 : index
    %c352 = arith.constant 352 : index
    %95 = vector.load %arg1[%c0_96, %c352] : memref<16x400xbf16, #tpu.memory_space<vmem>>, vector<16x16xbf16>
    %cst_97 = arith.constant dense<0.000000e+00> : vector<16x16xf32>
    %96 = tpu.matmul %95, %6, %cst_97 {dimension_numbers = #tpu.dot_dimension_numbers<[1], [0], [0], [1], [0, 0, 1, 1], [], []>} : vector<16x16xbf16>, vector<16x16xbf16>, vector<16x16xf32> -> vector<16x16xf32>
    %97 = arith.addf %96, %5 : vector<16x16xf32>
    %c0_98 = arith.constant 0 : index
    %c352_99 = arith.constant 352 : index
    %98 = vector.load %arg6[%c0_98, %c352_99] : memref<16x400xf32, #tpu.memory_space<vmem>>, vector<16x16xf32>
    tpu.vector_store %arg6[%c0_98, %c352_99], %97 {strides = array<i32>} : memref<16x400xf32, #tpu.memory_space<vmem>>, vector<16x16xf32>,
    %c0_100 = arith.constant 0 : index
    %c368 = arith.constant 368 : index
    %99 = vector.load %arg1[%c0_100, %c368] : memref<16x400xbf16, #tpu.memory_space<vmem>>, vector<16x16xbf16>
    %cst_101 = arith.constant dense<0.000000e+00> : vector<16x16xf32>
    %100 = tpu.matmul %99, %6, %cst_101 {dimension_numbers = #tpu.dot_dimension_numbers<[1], [0], [0], [1], [0, 0, 1, 1], [], []>} : vector<16x16xbf16>, vector<16x16xbf16>, vector<16x16xf32> -> vector<16x16xf32>
    %101 = arith.addf %100, %5 : vector<16x16xf32>
    %c0_102 = arith.constant 0 : index
    %c368_103 = arith.constant 368 : index
    %102 = vector.load %arg6[%c0_102, %c368_103] : memref<16x400xf32, #tpu.memory_space<vmem>>, vector<16x16xf32>
    tpu.vector_store %arg6[%c0_102, %c368_103], %101 {strides = array<i32>} : memref<16x400xf32, #tpu.memory_space<vmem>>, vector<16x16xf32>,
    %c0_104 = arith.constant 0 : index
    %c384 = arith.constant 384 : index
    %103 = vector.load %arg1[%c0_104, %c384] : memref<16x400xbf16, #tpu.memory_space<vmem>>, vector<16x16xbf16>
    %cst_105 = arith.constant dense<0.000000e+00> : vector<16x16xf32>
    %104 = tpu.matmul %103, %6, %cst_105 {dimension_numbers = #tpu.dot_dimension_numbers<[1], [0], [0], [1], [0, 0, 1, 1], [], []>} : vector<16x16xbf16>, vector<16x16xbf16>, vector<16x16xf32> -> vector<16x16xf32>
    %105 = arith.addf %104, %5 : vector<16x16xf32>
    %c0_106 = arith.constant 0 : index
    %c384_107 = arith.constant 384 : index
    %106 = vector.load %arg6[%c0_106, %c384_107] : memref<16x400xf32, #tpu.memory_space<vmem>>, vector<16x16xf32>
    tpu.vector_store %arg6[%c0_106, %c384_107], %105 {strides = array<i32>} : memref<16x400xf32, #tpu.memory_space<vmem>>, vector<16x16xf32>,
    return
  }
  func.func @transform_0(%arg0: i32) -> (i32, i32) {
    %c0_i32 = arith.constant 0 : i32
    %c0_i32_0 = arith.constant 0 : i32
    return %arg0, %c0_i32 : i32, i32
  }
  func.func @transform_1(%arg0: i32) -> (i32, i32) {
    %c0_i32 = arith.constant 0 : i32
    %c0_i32_0 = arith.constant 0 : i32
    return %arg0, %c0_i32 : i32, i32
  }
  func.func @transform_2(%arg0: i32) -> (i32, i32) {
    %c0_i32 = arith.constant 0 : i32
    %c0_i32_0 = arith.constant 0 : i32
    %c0_i32_1 = arith.constant 0 : i32
    return %c0_i32, %c0_i32_0 : i32, i32
  }
  func.func @transform_3(%arg0: i32) -> (i32, i32) {
    %c0_i32 = arith.constant 0 : i32
    %c0_i32_0 = arith.constant 0 : i32
    %c0_i32_1 = arith.constant 0 : i32
    return %c0_i32, %c0_i32_0 : i32, i32
  }
  func.func @transform_4(%arg0: i32) -> (i32, i32) {
    %c0_i32 = arith.constant 0 : i32
    %c0_i32_0 = arith.constant 0 : i32
    %c0_i32_1 = arith.constant 0 : i32
    return %c0_i32, %c0_i32_0 : i32, i32
  }
  func.func @transform_5(%arg0: i32) -> (i32, i32) {
    %c0_i32 = arith.constant 0 : i32
    %c0_i32_0 = arith.constant 0 : i32
    return %arg0, %c0_i32 : i32, i32
  }
}

</mosaic_0001>

<bundles_post_ra>
// kernel: tpu_custom_call.1
= control target key start
LH: loop header
LB: loop body
LE: loop exit
PB: predicated region body
PF: predicated region fallthrough
CT: control target
= control target key end

     0   :  { %10 = vsyncpa [#allocation3], 0  ;;  %s2616_s0 = inlined_call_operand.hbm [shape: bf16[16,400], index: 0, kind: input, shape index: {}]   ;;  %s2617_s1 = inlined_call_operand.hbm [shape: bf16[16,32], index: 1, kind: input, shape index: {}]   ;;  %s2618_s2 = inlined_call_operand.hbm [shape: bf16[16,16], index: 2, kind: input, shape index: {}]   ;;  %s2619_s3 = inlined_call_operand.hbm [shape: bf16[32,16], index: 3, kind: input, shape index: {}]   ;;  %s2620_s4 = inlined_call_operand.hbm [shape: f32[1,16], index: 4, kind: input, shape index: {}]   ;;  %s2621_s5 = inlined_call_operand.hbm [shape: f32[16,400], index: 5, kind: output, shape index: {}]  }
   0x1   :  { %11 = vsyncpa [#allocation6], 0 }
   0x2   :  { %12 = vsyncpa [#allocation9], 0 }
   0x3   :  { %13 = vsyncpa [#allocation4], 0  ;;  %s2187_s18 = smov [#allocation5]   ;;  %s2047_s22 = scalar_lea.hbm %s2617_s1, 128 }
   0x4   :  { %s31_s19 = sshll.u32 %s2187_s18, 4  ;;  %p2048_p0 = scmp.ne.s32.totalorder %s2617_s1, %s2047_s22  ;;  %s32_s19 = int_to_ptr.vmem [resolvable:$true] %s31_s19 }
   0x5   :  { %p2051_p1 = scmp.lt.u32.totalorder %s2047_s22, %s2617_s1 }
   0x7   :  { %p2053_p2 = pnand %p2051_p1, %p2048_p0 }
   0x9   :  { %2056 = shalt.err (!%p2053_p2)
}
   0xa   :  { %s2057_s27 = scalar_lea.vmem %s32_s19, 128  ;;  %p2062_p4 = scmp.lt.s32.totalorder %s32_s19, %s32_s19 }
   0xb   :  { %p2058_p3 = scmp.ne.s32.totalorder %s32_s19, %s2057_s27  ;;  %p2063_p5 = scmp.lt.s32.totalorder %s2057_s27, %s2057_s27 }
   0xd   :  { %p2064_p6 = por %p2063_p5, %p2062_p4 }
   0xf   :  { %p2065_p7 = pnand %p2064_p6, %p2058_p3 }
  0x11   :  { %2068 = shalt.err (!%p2065_p7)
}
  0x12   :  { %s2188_s28 = smov 64   ;;  %s2189_s29 = smov 4  }
  0x13   :  { %37 = dma.hbm_to_vmem [thread:$0]  %s2617_s1, 128, %s32_s19, [#allocation6], %s2188_s28, %s2188_s28, %s2189_s29  }
  0x14   :  { %s2190_s7 = smov [#allocation8]   ;;  %s2191_s9 = smov [#allocation2]  }
  0x15   :  { %s55_s8 = sshll.u32 %s2190_s7, 4  ;;  %s19_s10 = sshll.u32 %s2191_s9, 4  ;;  %s56_s8 = int_to_ptr.vmem [resolvable:$true] %s55_s8  ;;  %s20_s10 = int_to_ptr.vmem [resolvable:$true] %s19_s10 }
  0x16   :  { %s2069_s13 = scalar_lea.hbm %s2619_s3, 256 }
  0x17   :  { %p2070_p8 = scmp.ne.s32.totalorder %s2619_s3, %s2069_s13  ;;  %p2073_p9 = scmp.lt.u32.totalorder %s2069_s13, %s2619_s3 }
  0x19   :  { %p2075_p10 = pnand %p2073_p9, %p2070_p8 }
  0x1b   :  { %2078 = shalt.err (!%p2075_p10)
}
  0x1c   :  { %s2079_s1 = scalar_lea.vmem %s56_s8, 256  ;;  %p2084_p12 = scmp.lt.s32.totalorder %s56_s8, %s56_s8 }
  0x1d   :  { %p2080_p11 = scmp.ne.s32.totalorder %s56_s8, %s2079_s1  ;;  %p2085_p13 = scmp.lt.s32.totalorder %s2079_s1, %s2079_s1 }
  0x1f   :  { %p2086_p0 = por %p2085_p13, %p2084_p12 }
  0x21   :  { %p2087_p1 = pnand %p2086_p0, %p2080_p11 }
  0x23   :  { %2090 = shalt.err (!%p2087_p1)
}
  0x24   :  { %61 = dma.hbm_to_vmem [thread:$0]  %s2619_s3, 256, %s56_s8, [#allocation9], %s2188_s28, %s2188_s28, %s2189_s29  }
  0x25   :  { %s2091_s22 = scalar_lea.hbm %s2616_s0, 512 }
  0x26   :  { %p2092_p2 = scmp.ne.s32.totalorder %s2616_s0, %s2091_s22  ;;  %p2095_p3 = scmp.lt.u32.totalorder %s2091_s22, %s2616_s0 }
  0x28   :  { %p2097_p4 = pnand %p2095_p3, %p2092_p2 }
  0x2a   :  { %2100 = shalt.err (!%p2097_p4)
}
  0x2b   :  { %s2101_s27 = scalar_lea.vmem %s20_s10, 512  ;;  %p2106_p6 = scmp.lt.s32.totalorder %s20_s10, %s20_s10 }
  0x2c   :  { %p2102_p5 = scmp.ne.s32.totalorder %s20_s10, %s2101_s27  ;;  %p2107_p7 = scmp.lt.s32.totalorder %s2101_s27, %s2101_s27 }
  0x2e   :  { %p2108_p8 = por %p2107_p7, %p2106_p6 }
  0x30   :  { %p2109_p9 = pnand %p2108_p8, %p2102_p5 }
  0x32   :  { %2112 = shalt.err (!%p2109_p9)
}
  0x33   :  { %s2192_s3 = smov 256   ;;  %s2193_s30 = smov 16  }
  0x34   :  { %25 = dma.hbm_to_vmem [thread:$0]  %s2616_s0, 512, %s20_s10, [#allocation3], %s2192_s3, %s2192_s3, %s2193_s30  }
  0x35   :  { %s2194_s8 = smov [#allocation7]   ;;  %s2195_s11 = smov [#allocation10]  }
  0x36   :  { %s43_s9 = sshll.u32 %s2194_s8, 4  ;;  %s68_s12 = sshll.u32 %s2195_s11, 4  ;;  %s44_s9 = int_to_ptr.vmem [resolvable:$true] %s43_s9  ;;  %s69_s12 = int_to_ptr.vmem [resolvable:$true] %s68_s12 }
  0x37   :  { %s2113_s15 = scalar_lea.hbm %s2618_s2, 128 }
  0x38   :  { %p2114_p10 = scmp.ne.s32.totalorder %s2618_s2, %s2113_s15  ;;  %p2117_p11 = scmp.lt.u32.totalorder %s2113_s15, %s2618_s2 }
  0x3a   :  { %p2119_p12 = pnand %p2117_p11, %p2114_p10 }
  0x3c   :  { %2122 = shalt.err (!%p2119_p12)
}
  0x3d   :  { %s2123_s0 = scalar_lea.vmem %s44_s9, 128  ;;  %p2128_p0 = scmp.lt.s32.totalorder %s44_s9, %s44_s9 }
  0x3e   :  { %p2124_p13 = scmp.ne.s32.totalorder %s44_s9, %s2123_s0  ;;  %p2129_p1 = scmp.lt.s32.totalorder %s2123_s0, %s2123_s0 }
  0x40   :  { %p2130_p2 = por %p2129_p1, %p2128_p0 }
  0x42   :  { %p2131_p3 = pnand %p2130_p2, %p2124_p13 }
  0x44   :  { %2134 = shalt.err (!%p2131_p3)
}
  0x45   :  { %49 = dma.hbm_to_vmem [thread:$0]  %s2618_s2, 128, %s44_s9, [#allocation6], %s2188_s28, %s2188_s28, %s2189_s29  }
  0x46   :  { %s2135_s22 = scalar_lea.hbm %s2620_s4, 16 }
  0x47   :  { %p2136_p4 = scmp.ne.s32.totalorder %s2620_s4, %s2135_s22  ;;  %p2139_p5 = scmp.lt.u32.totalorder %s2135_s22, %s2620_s4 }
  0x49   :  { %p2141_p6 = pnand %p2139_p5, %p2136_p4 }
  0x4b   :  { %2144 = shalt.err (!%p2141_p6)
}
  0x4c   :  { %s2145_s27 = scalar_lea.vmem %s69_s12, 16  ;;  %s2149_s3 = scalar_lea.vmem %s69_s12, 32 }
  0x4d   :  { %p2146_p7 = scmp.ne.s32.totalorder %s69_s12, %s2145_s27  ;;  %p2150_p8 = scmp.lt.s32.totalorder %s69_s12, %s69_s12 }
  0x4e   :  { %p2151_p9 = scmp.lt.s32.totalorder %s2149_s3, %s2145_s27 }
  0x50   :  { %p2152_p10 = por %p2151_p9, %p2150_p8 }
  0x52   :  { %p2153_p11 = pnand %p2152_p10, %p2146_p7 }
  0x54   :  { %2156 = shalt.err (!%p2153_p11)
}
  0x55   :  { %71 = dma.hbm_to_vmem [thread:$0]  %s2620_s4, 16, %s69_s12, [#allocation9]  }
  0x56   :  { %2179 = dma.done.wait [#allocation3], 512  }
  0x57   :  { %2180 = vsyncadd [#allocation3], 4294966784 }
  0x58   :  { %2181 = dma.done.wait [#allocation6], 256  }
  0x59   :  { %2182 = vsyncadd [#allocation6], 4294967040 }
  0x5a   :  { %2183 = dma.done.wait [#allocation9], 272  }
  0x5b   :  { %2184 = vsyncadd [#allocation9], 4294967024  ;;  %v2196_v0 = vmov 0.0   ;;  %vm2197_vm0 = vmmov 0   ;;  %v2018_v1 = vld [vmem:[#allocation2] ss:$16 sps:$4 sm:$0xff]  }
  0x5c   :  { %1842 = vmatprep.subr.bf16.mxu0 %v2196_v0  ;;  %1850 = vmatprep.subr.bf16.mxu1 %v2196_v0  ;;  %v2019_v2 = vld [vmem:[#allocation2] ss:$16 sps:$4 sm:$0xff]   ;;  %s2198_s4 = smov 112   ;;  %s2199_s6 = smov 80   ;;  %v2025_v8 = vld [vmem:[#allocation2 + $0x4] ss:$16 sps:$4 sm:$0xff]  }
  0x5d   :  { %1846 = vmatprep.mubr.msk.bf16.mxu0 %vm2197_vm0, %v2196_v0  ;;  %1852 = vmatprep.mubr.msk.bf16.mxu1 %vm2197_vm0, %v2196_v0  ;;  %v2020_v3 = vld [vmem:[#allocation2] ss:$16 sps:$4 sm:$0xff]   ;;  %s2200_s7 = smov 96   ;;  %s2201_s8 = smov 48   ;;  %v2026_v9 = vld [vmem:[#allocation2 + $0x4] ss:$16 sps:$4 sm:$0xff]  }
  0x5e   :  { %232 = vrot.lane.b32.xlu0 %v2018_v1, %s2198_s4  ;;  %360 = vrot.lane.b32.xlu1 %v2020_v3, %s2199_s6  ;;  %v2021_v4 = vld [vmem:[#allocation2] ss:$16 sps:$4 sm:$0xff]   ;;  %s2202_s9 = smov 32   ;;  %v2027_v10 = vld [vmem:[#allocation2 + $0x4] ss:$16 sps:$4 sm:$0xff]   ;;  %v2040_v16 = vld [vmem:[#allocation8 + $0x8] sm:$0xff]  }
  0x5f   :  { %v2022_v5 = vld [vmem:[#allocation2] ss:$16 sps:$4 sm:$0xff]   ;;  %v2028_v11 = vld [vmem:[#allocation2 + $0x4] ss:$16 sps:$4 sm:$0xff]   ;;  %v2322_v17 = vld [vmem:[#allocation7] sm:$0xff]   ;;  %vm178_vm1 = vcmask 130048  }
  0x60   :  { %v2023_v6 = vld [vmem:[#allocation2] ss:$16 sps:$4 sm:$0xff]   ;;  %v2029_v12 = vld [vmem:[#allocation2 + $0x4] ss:$16 sps:$4 sm:$0xff]   ;;  %v2032_v18 = vld [vmem:[#allocation2 + $0x8] ss:$16 sps:$4 sm:$0xff]   ;;  %1851 = vmatpush3.bf16.msra.mxu1 %v2322_v17 }
  0x61   :  { %v2024_v7 = vld [vmem:[#allocation2] ss:$16 sps:$4 sm:$0xff]   ;;  %v2030_v13 = vld [vmem:[#allocation2 + $0x4] ss:$16 sps:$4 sm:$0xff]   ;;  %vm118_vm2 = vcmask 261120   ;;  %1856 = vmatprep.subr.bf16.mxu1 %v2196_v0  ;;  %vm286_vm3 = vcmask 261248  }
  0x62   :  { %296 = vrot.lane.b32.xlu0 %v2019_v2, %s2200_s7  ;;  %424 = vrot.lane.b32.xlu1 %v2021_v4, %s2188_s28  ;;  %v2039_v14 = vld [vmem:[#allocation8] sm:$0xff]   ;;  %v2042_v20 = vld [vmem:[#allocation5] sm:$0xff]   ;;  %v2033_v21 = vld [vmem:[#allocation2 + $0x8] ss:$16 sps:$4 sm:$0xff]   ;;  %vm350_vm4 = vcmask 392448   ;;  %vm414_vm5 = vcmask 523648  }
  0x63   :  { %v2031_v15 = vld [vmem:[#allocation2 + $0x4] ss:$16 sps:$4 sm:$0xff]   ;;  %1843 = vmatpush3.bf16.msra.mxu0 %v2039_v14  ;;  %v2043_v19 = vld [vmem:[#allocation2] ss:$16 sps:$4 sm:$0xff]   ;;  %v2034_v22 = vld [vmem:[#allocation2 + $0x8] ss:$16 sps:$4 sm:$0xff]  }
  0x64   :  { %1844 = vmatprep.subr.bf16.mxu0 %v2196_v0  ;;  %1853 = vmatmul.mubr.msk.bf16.vlgmr.msra.gmra.mrb[0].mxu1 %vm178_vm1, %v2043_v19  ;;  %v2035_v23 = vld [vmem:[#allocation2 + $0x8] ss:$16 sps:$4 sm:$0xff]   ;;  %v2044_v34 = vld [vmem:[#allocation2 + $0x4] ss:$16 sps:$4 sm:$0xff]   ;;  %v2046_v50 = vld [vmem:[#allocation2 + $0xc] ss:$16 sps:$4 sm:$0xff]  }
  0x65   :  { %1857 = vmatpush3.bf16.msra.mxu1 %v2322_v17  ;;  %1858 = vmatprep.mubr.msk.bf16.mxu1 %vm2197_vm0, %v2196_v0  ;;  %v2036_v24 = vld [vmem:[#allocation2 + $0x8] ss:$16 sps:$4 sm:$0xff]   ;;  %v1733_v51 = vld [vmem:[#allocation10] ss:$0 sm:$0xff]  ;;  %vm478_vm6 = vcmask 654848   ;;  %vm542_vm7 = vcmask 786048  }
  0x66   :  { %488 = vrot.lane.b32.xlu0 %v2022_v5, %s2201_s8  ;;  %552 = vrot.lane.b32.xlu1 %v2023_v6, %s2202_s9  ;;  %v2037_v25 = vld [vmem:[#allocation2 + $0x8] ss:$16 sps:$4 sm:$0xff]   ;;  %vm606_vm8 = vcmask 917248   ;;  %vm670_vm9 = vcmask 1048448  }
  0x67   :  { %1845 = vmatpush3.bf16.msra.mxu0 %v2040_v16  ;;  %1868 = vmatprep.subr.bf16.mxu1 %v2196_v0  ;;  %v2038_v26 = vld [vmem:[#allocation2 + $0x8] ss:$16 sps:$4 sm:$0xff]  }
  0x68   :  { %1862 = vmatprep.subr.bf16.mxu0 %v2196_v0  ;;  %v2045_v42 = vld [vmem:[#allocation2 + $0x8] ss:$16 sps:$4 sm:$0xff]  }
  0x6a   :  { %616 = vrot.lane.b32.xlu0 %v2024_v7, %s2193_s30  ;;  %733 = vrot.lane.b32.xlu1 %v2025_v8, %s2198_s4 }
  0x6b   :  { %1847 = vmatmul.mubr.msk.bf16.vlgmr.msra.gmra.mrb[0].mxu0 %vm118_vm2, %v2042_v20 }
  0x6c   :  { %1863 = vmatpush3.bf16.msra.mxu0 %v2322_v17  ;;  %1864 = vmatprep.mubr.msk.bf16.mxu0 %vm2197_vm0, %v2196_v0 }
  0x6d   :  { %1874 = vmatprep.subr.bf16.mxu0 %v2196_v0 }
  0x6e   :  { %796 = vrot.lane.b32.xlu0 %v2026_v9, %s2200_s7  ;;  %859 = vrot.lane.b32.xlu1 %v2027_v10, %s2199_s6 }
  0x72   :  { %922 = vrot.lane.b32.xlu0 %v2028_v11, %s2188_s28  ;;  %985 = vrot.lane.b32.xlu1 %v2029_v12, %s2201_s8 }
  0x76   :  { %1048 = vrot.lane.b32.xlu0 %v2030_v13, %s2202_s9  ;;  %1111 = vrot.lane.b32.xlu1 %v2031_v15, %s2193_s30 }
  0x7a   :  { %1227 = vrot.lane.b32.xlu0 %v2032_v18, %s2198_s4  ;;  %1290 = vrot.lane.b32.xlu1 %v2033_v21, %s2200_s7 }
  0x7e   :  { %1353 = vrot.lane.b32.xlu0 %v2034_v22, %s2199_s6  ;;  %1416 = vrot.lane.b32.xlu1 %v2035_v23, %s2188_s28 }
  0x82   :  { %1479 = vrot.lane.b32.xlu0 %v2036_v24, %s2201_s8  ;;  %1542 = vrot.lane.b32.xlu1 %v2037_v25, %s2202_s9 }
  0x86   :  { %1605 = vrot.lane.b32.xlu0 %v2038_v26, %s2193_s30 }
  0xd0   :  { %v233_v27 = vpop.permute.xlu0 %232  ;;  %v361_v29 = vpop.permute.xlu1 %360 }
  0xd1   :  { %1859 = vmatmul.mubr.msk.bf16.vlgmr.msra.gmra.mrb[4].mxu1 %vm178_vm1, %v233_v27 }
  0xd2   :  { %1869 = vmatpush3.bf16.msra.mxu1 %v2322_v17  ;;  %1870 = vmatprep.mubr.msk.bf16.mxu1 %vm2197_vm0, %v2196_v0 }
  0xd3   :  { %1880 = vmatprep.subr.bf16.mxu1 %v2196_v0 }
  0xd4   :  { %v297_v28 = vpop.permute.xlu0 %296  ;;  %v425_v30 = vpop.permute.xlu1 %424 }
  0xd5   :  { %1865 = vmatmul.mubr.msk.bf16.vlgmr.msra.gmra.mrb[4].mxu0 %vm178_vm1, %v297_v28 }
  0xd6   :  { %1875 = vmatpush3.bf16.msra.mxu0 %v2322_v17  ;;  %1876 = vmatprep.mubr.msk.bf16.mxu0 %vm2197_vm0, %v2196_v0 }
  0xd7   :  { %1886 = vmatprep.subr.bf16.mxu0 %v2196_v0 }
  0xd8   :  { %v489_v31 = vpop.permute.xlu0 %488  ;;  %v553_v32 = vpop.permute.xlu1 %552 }
  0xd9   :  { %1871 = vmatmul.mubr.msk.bf16.vlgmr.msra.gmra.mrb[8].mxu1 %vm178_vm1, %v361_v29 }
  0xda   :  { %1881 = vmatpush3.bf16.msra.mxu1 %v2322_v17  ;;  %1882 = vmatprep.mubr.msk.bf16.mxu1 %vm2197_vm0, %v2196_v0 }
  0xdb   :  { %1892 = vmatprep.subr.bf16.mxu1 %v2196_v0 }
  0xdc   :  { %v617_v33 = vpop.permute.xlu0 %616  ;;  %v734_v35 = vpop.permute.xlu1 %733 }
  0xdd   :  { %1877 = vmatmul.mubr.msk.bf16.vlgmr.msra.gmra.mrb[8].mxu0 %vm178_vm1, %v425_v30 }
  0xde   :  { %1887 = vmatpush3.bf16.msra.mxu0 %v2322_v17  ;;  %1888 = vmatprep.mubr.msk.bf16.mxu0 %vm2197_vm0, %v2196_v0 }
  0xdf   :  { %1898 = vmatprep.subr.bf16.mxu0 %v2196_v0 }
  0xe0   :  { %v797_v36 = vpop.permute.xlu0 %796  ;;  %v860_v37 = vpop.permute.xlu1 %859 }
  0xe1   :  { %1883 = vmatmul.mubr.msk.bf16.vlgmr.msra.gmra.mrb[12].mxu1 %vm178_vm1, %v489_v31 }
  0xe2   :  { %1893 = vmatpush3.bf16.msra.mxu1 %v2322_v17  ;;  %1894 = vmatprep.mubr.msk.bf16.mxu1 %vm2197_vm0, %v2196_v0 }
  0xe3   :  { %1904 = vmatprep.subr.bf16.mxu1 %v2196_v0 }
  0xe4   :  { %v923_v38 = vpop.permute.xlu0 %922  ;;  %v986_v39 = vpop.permute.xlu1 %985 }
  0xe5   :  { %1889 = vmatmul.mubr.msk.bf16.vlgmr.msra.gmra.mrb[12].mxu0 %vm178_vm1, %v553_v32 }
  0xe6   :  { %1899 = vmatpush3.bf16.msra.mxu0 %v2322_v17  ;;  %1900 = vmatprep.mubr.msk.bf16.mxu0 %vm2197_vm0, %v2196_v0 }
  0xe7   :  { %1910 = vmatprep.subr.bf16.mxu0 %v2196_v0 }
  0xe8   :  { %v1049_v40 = vpop.permute.xlu0 %1048  ;;  %v1112_v41 = vpop.permute.xlu1 %1111 }
  0xe9   :  { %1895 = vmatmul.mubr.msk.bf16.vlgmr.msra.gmra.mrb[16].mxu1 %vm178_vm1, %v617_v33 }
  0xea   :  { %1905 = vmatpush3.bf16.msra.mxu1 %v2322_v17  ;;  %1906 = vmatprep.mubr.msk.bf16.mxu1 %vm2197_vm0, %v2196_v0 }
  0xeb   :  { %1916 = vmatprep.subr.bf16.mxu1 %v2196_v0 }
  0xec   :  { %v1228_v43 = vpop.permute.xlu0 %1227  ;;  %v1291_v44 = vpop.permute.xlu1 %1290 }
  0xed   :  { %1901 = vmatmul.mubr.msk.bf16.vlgmr.msra.gmra.mrb[16].mxu0 %vm178_vm1, %v2044_v34 }
  0xee   :  { %1911 = vmatpush3.bf16.msra.mxu0 %v2322_v17  ;;  %1912 = vmatprep.mubr.msk.bf16.mxu0 %vm2197_vm0, %v2196_v0 }
  0xef   :  { %1922 = vmatprep.subr.bf16.mxu0 %v2196_v0 }
  0xf0   :  { %v1354_v45 = vpop.permute.xlu0 %1353  ;;  %v1417_v46 = vpop.permute.xlu1 %1416 }
  0xf1   :  { %1907 = vmatmul.mubr.msk.bf16.vlgmr.msra.gmra.mrb[20].mxu1 %vm178_vm1, %v734_v35 }
  0xf2   :  { %1917 = vmatpush3.bf16.msra.mxu1 %v2322_v17  ;;  %1918 = vmatprep.mubr.msk.bf16.mxu1 %vm2197_vm0, %v2196_v0 }
  0xf3   :  { %1928 = vmatprep.subr.bf16.mxu1 %v2196_v0 }
  0xf4   :  { %v1480_v47 = vpop.permute.xlu0 %1479  ;;  %v1543_v48 = vpop.permute.xlu1 %1542 }
  0xf5   :  { %1913 = vmatmul.mubr.msk.bf16.vlgmr.msra.gmra.mrb[20].mxu0 %vm178_vm1, %v797_v36 }
  0xf6   :  { %1923 = vmatpush3.bf16.msra.mxu0 %v2322_v17  ;;  %1924 = vmatprep.mubr.msk.bf16.mxu0 %vm2197_vm0, %v2196_v0 }
  0xf7   :  { %1934 = vmatprep.subr.bf16.mxu0 %v2196_v0 }
  0xf8   :  { %v1606_v49 = vpop.permute.xlu0 %1605 }
  0xf9   :  { %1919 = vmatmul.mubr.msk.bf16.vlgmr.msra.gmra.mrb[24].mxu1 %vm178_vm1, %v860_v37 }
  0xfa   :  { %1929 = vmatpush3.bf16.msra.mxu1 %v2322_v17  ;;  %1930 = vmatprep.mubr.msk.bf16.mxu1 %vm2197_vm0, %v2196_v0 }
  0xfb   :  { %1940 = vmatprep.subr.bf16.mxu1 %v2196_v0 }
  0xfd   :  { %1925 = vmatmul.mubr.msk.bf16.vlgmr.msra.gmra.mrb[24].mxu0 %vm178_vm1, %v923_v38 }
  0xfe   :  { %1935 = vmatpush3.bf16.msra.mxu0 %v2322_v17  ;;  %1936 = vmatprep.mubr.msk.bf16.mxu0 %vm2197_vm0, %v2196_v0 }
  0xff   :  { %1946 = vmatprep.subr.bf16.mxu0 %v2196_v0 }
 0x101   :  { %1931 = vmatmul.mubr.msk.bf16.vlgmr.msra.gmra.mrb[28].mxu1 %vm178_vm1, %v986_v39 }
 0x102   :  { %1941 = vmatpush3.bf16.msra.mxu1 %v2322_v17  ;;  %1942 = vmatprep.mubr.msk.bf16.mxu1 %vm2197_vm0, %v2196_v0 }
 0x103   :  { %1952 = vmatprep.subr.bf16.mxu1 %v2196_v0 }
 0x105   :  { %1937 = vmatmul.mubr.msk.bf16.vlgmr.msra.gmra.mrb[28].mxu0 %vm178_vm1, %v1049_v40 }
 0x106   :  { %1947 = vmatpush3.bf16.msra.mxu0 %v2322_v17  ;;  %1948 = vmatprep.mubr.msk.bf16.mxu0 %vm2197_vm0, %v2196_v0 }
 0x107   :  { %1958 = vmatprep.subr.bf16.mxu0 %v2196_v0 }
 0x109   :  { %1943 = vmatmul.mubr.msk.bf16.vlgmr.msra.gmra.mrb[32].mxu1 %vm178_vm1, %v1112_v41 }
 0x10a   :  { %1953 = vmatpush3.bf16.msra.mxu1 %v2322_v17  ;;  %1954 = vmatprep.mubr.msk.bf16.mxu1 %vm2197_vm0, %v2196_v0 }
 0x10b   :  { %1964 = vmatprep.subr.bf16.mxu1 %v2196_v0 }
 0x10d   :  { %1949 = vmatmul.mubr.msk.bf16.vlgmr.msra.gmra.mrb[32].mxu0 %vm178_vm1, %v2045_v42 }
 0x10e   :  { %1959 = vmatpush3.bf16.msra.mxu0 %v2322_v17  ;;  %1960 = vmatprep.mubr.msk.bf16.mxu0 %vm2197_vm0, %v2196_v0 }
 0x10f   :  { %1970 = vmatprep.subr.bf16.mxu0 %v2196_v0 }
 0x111   :  { %1955 = vmatmul.mubr.msk.bf16.vlgmr.msra.gmra.mrb[36].mxu1 %vm178_vm1, %v1228_v43 }
 0x112   :  { %1965 = vmatpush3.bf16.msra.mxu1 %v2322_v17  ;;  %1966 = vmatprep.mubr.msk.bf16.mxu1 %vm2197_vm0, %v2196_v0 }
 0x113   :  { %1976 = vmatprep.subr.bf16.mxu1 %v2196_v0 }
 0x115   :  { %1961 = vmatmul.mubr.msk.bf16.vlgmr.msra.gmra.mrb[36].mxu0 %vm178_vm1, %v1291_v44 }
 0x116   :  { %1971 = vmatpush3.bf16.msra.mxu0 %v2322_v17  ;;  %1972 = vmatprep.mubr.msk.bf16.mxu0 %vm2197_vm0, %v2196_v0 }
 0x117   :  { %1982 = vmatprep.subr.bf16.mxu0 %v2196_v0 }
 0x119   :  { %1967 = vmatmul.mubr.msk.bf16.vlgmr.msra.gmra.mrb[40].mxu1 %vm178_vm1, %v1354_v45 }
 0x11a   :  { %1977 = vmatpush3.bf16.msra.mxu1 %v2322_v17  ;;  %1978 = vmatprep.mubr.msk.bf16.mxu1 %vm2197_vm0, %v2196_v0 }
 0x11b   :  { %1988 = vmatprep.subr.bf16.mxu1 %v2196_v0 }
 0x11d   :  { %1973 = vmatmul.mubr.msk.bf16.vlgmr.msra.gmra.mrb[40].mxu0 %vm178_vm1, %v1417_v46 }
 0x11e   :  { %1983 = vmatpush3.bf16.msra.mxu0 %v2322_v17  ;;  %1984 = vmatprep.mubr.msk.bf16.mxu0 %vm2197_vm0, %v2196_v0 }
 0x11f   :  { %1994 = vmatprep.subr.bf16.mxu0 %v2196_v0 }
 0x121   :  { %1979 = vmatmul.mubr.msk.bf16.vlgmr.msra.gmra.mrb[44].mxu1 %vm178_vm1, %v1480_v47 }
 0x122   :  { %1989 = vmatpush3.bf16.msra.mxu1 %v2322_v17  ;;  %1990 = vmatprep.mubr.msk.bf16.mxu1 %vm2197_vm0, %v2196_v0 }
 0x125   :  { %1985 = vmatmul.mubr.msk.bf16.vlgmr.msra.gmra.mrb[44].mxu0 %vm178_vm1, %v1543_v48 }
 0x126   :  { %1995 = vmatpush3.bf16.msra.mxu0 %v2322_v17  ;;  %1996 = vmatprep.mubr.msk.bf16.mxu0 %vm2197_vm0, %v2196_v0 }
 0x129   :  { %1991 = vmatmul.mubr.msk.bf16.vlgmr.msra.gmra.mrb[48].mxu1 %vm178_vm1, %v1606_v49 }
 0x12d   :  { %1997 = vmatmul.mubr.msk.bf16.vlgmr.msra.gmra.mrb[48].mxu0 %vm178_vm1, %v2046_v50 }
 0x137   :  { %v216_v52 = vpop.f32.mrb[0].mxu1 }
 0x138   :  { %v1854_v53 = vpop.f32.mrb[1].mxu1 }
 0x139   :  { %v219_v55 = vpop.f32.mrb[2].mxu1 }
 0x13a   :  { %v1855_v58 = vpop.f32.mrb[3].mxu1 }
 0x13e   :  { %v156_v54 = vpop.f32.mrb[0].mxu0 }
 0x13f   :  { %v2457_v56 = vadd.f32 %v1733_v51, %v156_v54  ;;  %v1848_v57 = vpop.f32.mrb[1].mxu0 }
 0x140   :  { %v159_v59 = vpop.f32.mrb[2].mxu0 }
 0x141   :  { %v217_v60 = vadd.f32 %v216_v52, %v2457_v56  ;;  %v2460_v61 = vadd.f32 %v1733_v51, %v159_v59  ;;  %v1849_v62 = vpop.f32.mrb[3].mxu0 }
 0x143   :  { %223 = vst.msk [vmem:[#allocation11] sm:$0xff] %vm178_vm1, %v217_v60  ;;  %v220_v63 = vadd.f32 %v219_v55, %v2460_v61 }
 0x145   :  { %224 = vst.msk [vmem:[#allocation11 + $0x20] sm:$0xff] %vm178_vm1, %v220_v63 }
 0x1a4   :  { %v271_v0 = vpop.f32.mrb[4].mxu1 }
 0x1a5   :  { %v272_v1 = vadd.f32 %v271_v0, %v2457_v56  ;;  %v1860_v2 = vpop.f32.mrb[5].mxu1 }
 0x1a6   :  { %v274_v3 = vpop.f32.mrb[6].mxu1 }
 0x1a7   :  { %v275_v4 = vadd.f32 %v274_v3, %v2460_v61  ;;  %v1861_v5 = vpop.f32.mrb[7].mxu1  ;;  %280 = vrot.lane.b32.xlu1 %v272_v1, %s2193_s30 }
 0x1a8   :  { %v335_v6 = vpop.f32.mrb[4].mxu0 }
 0x1a9   :  { %v336_v7 = vadd.f32 %v335_v6, %v2457_v56  ;;  %282 = vrot.lane.b32.xlu0 %v275_v4, %s2193_s30  ;;  %v1866_v8 = vpop.f32.mrb[5].mxu0 }
 0x1aa   :  { %v338_v9 = vpop.f32.mrb[6].mxu0 }
 0x1ab   :  { %v339_v10 = vadd.f32 %v338_v9, %v2460_v61  ;;  %344 = vrot.lane.b32.xlu1 %v336_v7, %s2202_s9  ;;  %v1867_v11 = vpop.f32.mrb[7].mxu0 }
 0x1ac   :  { %v399_v12 = vpop.f32.mrb[8].mxu1 }
 0x1ad   :  { %v400_v13 = vadd.f32 %v399_v12, %v2457_v56  ;;  %v1872_v14 = vpop.f32.mrb[9].mxu1  ;;  %346 = vrot.lane.b32.xlu0 %v339_v10, %s2202_s9 }
 0x1ae   :  { %v402_v15 = vpop.f32.mrb[10].mxu1 }
 0x1af   :  { %v403_v16 = vadd.f32 %v402_v15, %v2460_v61  ;;  %v1873_v17 = vpop.f32.mrb[11].mxu1  ;;  %408 = vrot.lane.b32.xlu1 %v400_v13, %s2201_s8 }
 0x1b0   :  { %v463_v18 = vpop.f32.mrb[8].mxu0 }
 0x1b1   :  { %v464_v19 = vadd.f32 %v463_v18, %v2457_v56  ;;  %410 = vrot.lane.b32.xlu0 %v403_v16, %s2201_s8  ;;  %v1878_v20 = vpop.f32.mrb[9].mxu0 }
 0x1b2   :  { %v466_v21 = vpop.f32.mrb[10].mxu0 }
 0x1b3   :  { %v467_v22 = vadd.f32 %v466_v21, %v2460_v61  ;;  %472 = vrot.lane.b32.xlu1 %v464_v19, %s2188_s28  ;;  %v1879_v23 = vpop.f32.mrb[11].mxu0 }
 0x1b4   :  { %v527_v24 = vpop.f32.mrb[12].mxu1 }
 0x1b5   :  { %v528_v25 = vadd.f32 %v527_v24, %v2457_v56  ;;  %v1884_v26 = vpop.f32.mrb[13].mxu1  ;;  %474 = vrot.lane.b32.xlu0 %v467_v22, %s2188_s28 }
 0x1b6   :  { %v530_v27 = vpop.f32.mrb[14].mxu1 }
 0x1b7   :  { %v531_v28 = vadd.f32 %v530_v27, %v2460_v61  ;;  %v1885_v29 = vpop.f32.mrb[15].mxu1  ;;  %536 = vrot.lane.b32.xlu1 %v528_v25, %s2199_s6 }
 0x1b8   :  { %v591_v30 = vpop.f32.mrb[12].mxu0 }
 0x1b9   :  { %v592_v31 = vadd.f32 %v591_v30, %v2457_v56  ;;  %538 = vrot.lane.b32.xlu0 %v531_v28, %s2199_s6  ;;  %v1890_v32 = vpop.f32.mrb[13].mxu0 }
 0x1ba   :  { %v594_v33 = vpop.f32.mrb[14].mxu0 }
 0x1bb   :  { %v595_v34 = vadd.f32 %v594_v33, %v2460_v61  ;;  %600 = vrot.lane.b32.xlu1 %v592_v31, %s2200_s7  ;;  %v1891_v35 = vpop.f32.mrb[15].mxu0 }
 0x1bc   :  { %v655_v36 = vpop.f32.mrb[16].mxu1 }
 0x1bd   :  { %v656_v37 = vadd.f32 %v655_v36, %v2457_v56  ;;  %v1896_v38 = vpop.f32.mrb[17].mxu1  ;;  %602 = vrot.lane.b32.xlu0 %v595_v34, %s2200_s7 }
 0x1be   :  { %v658_v39 = vpop.f32.mrb[18].mxu1 }
 0x1bf   :  { %v659_v40 = vadd.f32 %v658_v39, %v2460_v61  ;;  %v1897_v41 = vpop.f32.mrb[19].mxu1  ;;  %664 = vrot.lane.b32.xlu1 %v656_v37, %s2198_s4 }
 0x1c0   :  { %v717_v42 = vpop.f32.mrb[16].mxu0 }
 0x1c1   :  { %v718_v43 = vadd.f32 %v717_v42, %v2457_v56  ;;  %666 = vrot.lane.b32.xlu0 %v659_v40, %s2198_s4  ;;  %v1902_v44 = vpop.f32.mrb[17].mxu0 }
 0x1c2   :  { %v720_v45 = vpop.f32.mrb[18].mxu0 }
 0x1c3   :  { %724 = vst.msk [vmem:[#allocation11 + $0x8] sm:$0xff] %vm178_vm1, %v718_v43  ;;  %v721_v46 = vadd.f32 %v720_v45, %v2460_v61  ;;  %v1903_v47 = vpop.f32.mrb[19].mxu0 }
 0x1c4   :  { %v772_v48 = vpop.f32.mrb[20].mxu1 }
 0x1c5   :  { %725 = vst.msk [vmem:[#allocation11 + $0x28] sm:$0xff] %vm178_vm1, %v721_v46  ;;  %v773_v49 = vadd.f32 %v772_v48, %v2457_v56  ;;  %v1908_v50 = vpop.f32.mrb[21].mxu1 }
 0x1c6   :  { %v775_v51 = vpop.f32.mrb[22].mxu1 }
 0x1c7   :  { %v776_v52 = vadd.f32 %v775_v51, %v2460_v61  ;;  %v1909_v53 = vpop.f32.mrb[23].mxu1  ;;  %781 = vrot.lane.b32.xlu1 %v773_v49, %s2193_s30 }
 0x1c8   :  { %v835_v54 = vpop.f32.mrb[20].mxu0 }
 0x1c9   :  { %v836_v55 = vadd.f32 %v835_v54, %v2457_v56  ;;  %783 = vrot.lane.b32.xlu0 %v776_v52, %s2193_s30  ;;  %v1914_v57 = vpop.f32.mrb[21].mxu0 }
 0x1ca   :  { %v838_v58 = vpop.f32.mrb[22].mxu0 }
 0x1cb   :  { %v839_v59 = vadd.f32 %v838_v58, %v2460_v61  ;;  %844 = vrot.lane.b32.xlu1 %v836_v55, %s2202_s9  ;;  %v1915_v60 = vpop.f32.mrb[23].mxu0 }
 0x1cc   :  { %v898_v62 = vpop.f32.mrb[24].mxu1 }
 0x1cd   :  { %v899_v63 = vadd.f32 %v898_v62, %v2457_v56  ;;  %v1920_v0 = vpop.f32.mrb[25].mxu1  ;;  %846 = vrot.lane.b32.xlu0 %v839_v59, %s2202_s9 }
 0x1ce   :  { %v901_v1 = vpop.f32.mrb[26].mxu1 }
 0x1cf   :  { %v902_v2 = vadd.f32 %v901_v1, %v2460_v61  ;;  %v1921_v3 = vpop.f32.mrb[27].mxu1  ;;  %907 = vrot.lane.b32.xlu1 %v899_v63, %s2201_s8 }
 0x1d0   :  { %v961_v4 = vpop.f32.mrb[24].mxu0 }
 0x1d1   :  { %v962_v5 = vadd.f32 %v961_v4, %v2457_v56  ;;  %909 = vrot.lane.b32.xlu0 %v902_v2, %s2201_s8  ;;  %v1926_v6 = vpop.f32.mrb[25].mxu0 }
 0x1d2   :  { %v964_v7 = vpop.f32.mrb[26].mxu0 }
 0x1d3   :  { %v965_v8 = vadd.f32 %v964_v7, %v2460_v61  ;;  %970 = vrot.lane.b32.xlu1 %v962_v5, %s2188_s28  ;;  %v1927_v9 = vpop.f32.mrb[27].mxu0 }
 0x1d4   :  { %v1024_v10 = vpop.f32.mrb[28].mxu1 }
 0x1d5   :  { %v1025_v11 = vadd.f32 %v1024_v10, %v2457_v56  ;;  %v1932_v12 = vpop.f32.mrb[29].mxu1  ;;  %972 = vrot.lane.b32.xlu0 %v965_v8, %s2188_s28 }
 0x1d6   :  { %v1027_v13 = vpop.f32.mrb[30].mxu1 }
 0x1d7   :  { %v1028_v14 = vadd.f32 %v1027_v13, %v2460_v61  ;;  %v1933_v15 = vpop.f32.mrb[31].mxu1  ;;  %1033 = vrot.lane.b32.xlu1 %v1025_v11, %s2199_s6 }
 0x1d8   :  { %v1087_v16 = vpop.f32.mrb[28].mxu0 }
 0x1d9   :  { %v1088_v17 = vadd.f32 %v1087_v16, %v2457_v56  ;;  %1035 = vrot.lane.b32.xlu0 %v1028_v14, %s2199_s6  ;;  %v1938_v18 = vpop.f32.mrb[29].mxu0 }
 0x1da   :  { %v1090_v19 = vpop.f32.mrb[30].mxu0 }
 0x1db   :  { %v1091_v20 = vadd.f32 %v1090_v19, %v2460_v61  ;;  %1096 = vrot.lane.b32.xlu1 %v1088_v17, %s2200_s7  ;;  %v1939_v21 = vpop.f32.mrb[31].mxu0 }
 0x1dc   :  { %v1150_v22 = vpop.f32.mrb[32].mxu1 }
 0x1dd   :  { %v1151_v23 = vadd.f32 %v1150_v22, %v2457_v56  ;;  %v1944_v24 = vpop.f32.mrb[33].mxu1  ;;  %1098 = vrot.lane.b32.xlu0 %v1091_v20, %s2200_s7 }
 0x1de   :  { %v1153_v25 = vpop.f32.mrb[34].mxu1 }
 0x1df   :  { %v1154_v26 = vadd.f32 %v1153_v25, %v2460_v61  ;;  %v1945_v27 = vpop.f32.mrb[35].mxu1  ;;  %1159 = vrot.lane.b32.xlu1 %v1151_v23, %s2198_s4 }
 0x1e0   :  { %v1211_v28 = vpop.f32.mrb[32].mxu0 }
 0x1e1   :  { %v1212_v29 = vadd.f32 %v1211_v28, %v2457_v56  ;;  %1161 = vrot.lane.b32.xlu0 %v1154_v26, %s2198_s4  ;;  %v1950_v30 = vpop.f32.mrb[33].mxu0 }
 0x1e2   :  { %v1214_v31 = vpop.f32.mrb[34].mxu0 }
 0x1e3   :  { %1218 = vst.msk [vmem:[#allocation11 + $0x10] sm:$0xff] %vm178_vm1, %v1212_v29  ;;  %v1215_v32 = vadd.f32 %v1214_v31, %v2460_v61  ;;  %v1951_v33 = vpop.f32.mrb[35].mxu0 }
 0x1e4   :  { %v1266_v34 = vpop.f32.mrb[36].mxu1 }
 0x1e5   :  { %1219 = vst.msk [vmem:[#allocation11 + $0x30] sm:$0xff] %vm178_vm1, %v1215_v32  ;;  %v1267_v35 = vadd.f32 %v1266_v34, %v2457_v56  ;;  %v1956_v36 = vpop.f32.mrb[37].mxu1 }
 0x1e6   :  { %v1269_v37 = vpop.f32.mrb[38].mxu1 }
 0x1e7   :  { %v1270_v38 = vadd.f32 %v1269_v37, %v2460_v61  ;;  %v1957_v39 = vpop.f32.mrb[39].mxu1  ;;  %1275 = vrot.lane.b32.xlu1 %v1267_v35, %s2193_s30 }
 0x1e8   :  { %v1329_v40 = vpop.f32.mrb[36].mxu0 }
 0x1e9   :  { %v1330_v41 = vadd.f32 %v1329_v40, %v2457_v56  ;;  %1277 = vrot.lane.b32.xlu0 %v1270_v38, %s2193_s30  ;;  %v1962_v42 = vpop.f32.mrb[37].mxu0 }
 0x1ea   :  { %v1332_v43 = vpop.f32.mrb[38].mxu0 }
 0x1eb   :  { %v1333_v44 = vadd.f32 %v1332_v43, %v2460_v61  ;;  %1338 = vrot.lane.b32.xlu1 %v1330_v41, %s2202_s9  ;;  %v1963_v45 = vpop.f32.mrb[39].mxu0 }
 0x1ec   :  { %v1392_v46 = vpop.f32.mrb[40].mxu1 }
 0x1ed   :  { %v1393_v47 = vadd.f32 %v1392_v46, %v2457_v56  ;;  %v1968_v48 = vpop.f32.mrb[41].mxu1  ;;  %1340 = vrot.lane.b32.xlu0 %v1333_v44, %s2202_s9 }
 0x1ee   :  { %v1395_v49 = vpop.f32.mrb[42].mxu1 }
 0x1ef   :  { %v1396_v50 = vadd.f32 %v1395_v49, %v2460_v61  ;;  %v1969_v51 = vpop.f32.mrb[43].mxu1  ;;  %1401 = vrot.lane.b32.xlu1 %v1393_v47, %s2201_s8 }
 0x1f0   :  { %v1455_v52 = vpop.f32.mrb[40].mxu0 }
 0x1f1   :  { %v1456_v53 = vadd.f32 %v1455_v52, %v2457_v56  ;;  %1403 = vrot.lane.b32.xlu0 %v1396_v50, %s2201_s8  ;;  %v1974_v54 = vpop.f32.mrb[41].mxu0 }
 0x1f2   :  { %v1458_v55 = vpop.f32.mrb[42].mxu0 }
 0x1f3   :  { %v1459_v57 = vadd.f32 %v1458_v55, %v2460_v61  ;;  %1464 = vrot.lane.b32.xlu1 %v1456_v53, %s2188_s28  ;;  %v1975_v58 = vpop.f32.mrb[43].mxu0 }
 0x1f4   :  { %v1518_v59 = vpop.f32.mrb[44].mxu1 }
 0x1f5   :  { %v1519_v60 = vadd.f32 %v1518_v59, %v2457_v56  ;;  %v1980_v62 = vpop.f32.mrb[45].mxu1  ;;  %1466 = vrot.lane.b32.xlu0 %v1459_v57, %s2188_s28  ;;  %s2203_s28 = smov [#allocation11]  }
 0x1f6   :  { %v1521_v63 = vpop.f32.mrb[46].mxu1  ;;  %s1719_s30 = sshll.u32 %s2203_s28, 4  ;;  %s1720_s30 = int_to_ptr.vmem [resolvable:$true] %s1719_s30 }
 0x1f7   :  { %v1522_v0 = vadd.f32 %v1521_v63, %v2460_v61  ;;  %v1981_v1 = vpop.f32.mrb[47].mxu1  ;;  %1527 = vrot.lane.b32.xlu1 %v1519_v60, %s2199_s6  ;;  %s2157_s11 = scalar_lea.vmem %s1720_s30, 1024  ;;  %p2162_p13 = scmp.lt.s32.totalorder %s1720_s30, %s1720_s30 }
 0x1f8   :  { %v1581_v2 = vpop.f32.mrb[44].mxu0  ;;  %p2158_p12 = scmp.ne.s32.totalorder %s1720_s30, %s2157_s11  ;;  %p2163_p0 = scmp.lt.s32.totalorder %s2157_s11, %s2157_s11 }
 0x1f9   :  { %v1582_v3 = vadd.f32 %v1581_v2, %v2457_v56  ;;  %1529 = vrot.lane.b32.xlu0 %v1522_v0, %s2199_s6  ;;  %v1986_v4 = vpop.f32.mrb[45].mxu0 }
 0x1fa   :  { %v1584_v5 = vpop.f32.mrb[46].mxu0  ;;  %p2164_p1 = por %p2163_p0, %p2162_p13 }
 0x1fb   :  { %v1585_v6 = vadd.f32 %v1584_v5, %v2460_v61  ;;  %1590 = vrot.lane.b32.xlu1 %v1582_v3, %s2200_s7  ;;  %v1987_v7 = vpop.f32.mrb[47].mxu0 }
 0x1fc   :  { %v1644_v8 = vpop.f32.mrb[48].mxu1  ;;  %p2165_p2 = pnand %p2164_p1, %p2158_p12 }
 0x1fd   :  { %v1645_v9 = vadd.f32 %v1644_v8, %v2457_v56  ;;  %v1992_v10 = vpop.f32.mrb[49].mxu1  ;;  %1592 = vrot.lane.b32.xlu0 %v1585_v6, %s2200_s7 }
 0x1fe   :  { %v1647_v11 = vpop.f32.mrb[50].mxu1 }
 0x1ff   :  { %v1648_v12 = vadd.f32 %v1647_v11, %v2460_v61  ;;  %v1993_v13 = vpop.f32.mrb[51].mxu1  ;;  %1653 = vrot.lane.b32.xlu1 %v1645_v9, %s2198_s4 }
 0x200   :  { %v1705_v14 = vpop.f32.mrb[48].mxu0 }
 0x201   :  { %v1706_v15 = vadd.f32 %v1705_v14, %v2457_v56  ;;  %1655 = vrot.lane.b32.xlu0 %v1648_v12, %s2198_s4  ;;  %v1998_v16 = vpop.f32.mrb[49].mxu0 }
 0x202   :  { %v1708_v17 = vpop.f32.mrb[50].mxu0 }
 0x203   :  { %1712 = vst.msk [vmem:[#allocation11 + $0x18] sm:$0xff] %vm178_vm1, %v1706_v15  ;;  %v1709_v18 = vadd.f32 %v1708_v17, %v2460_v61  ;;  %v1999_v19 = vpop.f32.mrb[51].mxu0 }
 0x205   :  { %1713 = vst.msk [vmem:[#allocation11 + $0x38] sm:$0xff] %vm178_vm1, %v1709_v18 }
 0x219   :  { %v281_v20 = vpop.permute.xlu1 %280 }
 0x21a   :  { %287 = vst.msk [vmem:[#allocation11] sm:$0xff] %vm286_vm3, %v281_v20 }
 0x21b   :  { %v283_v21 = vpop.permute.xlu0 %282 }
 0x21c   :  { %288 = vst.msk [vmem:[#allocation11 + $0x20] sm:$0xff] %vm286_vm3, %v283_v21 }
 0x21d   :  { %v345_v56 = vpop.permute.xlu1 %344 }
 0x21e   :  { %351 = vst.msk [vmem:[#allocation11] sm:$0xff] %vm350_vm4, %v345_v56 }
 0x21f   :  { %v347_v22 = vpop.permute.xlu0 %346 }
 0x220   :  { %352 = vst.msk [vmem:[#allocation11 + $0x20] sm:$0xff] %vm350_vm4, %v347_v22 }
 0x221   :  { %v409_v23 = vpop.permute.xlu1 %408 }
 0x222   :  { %415 = vst.msk [vmem:[#allocation11] sm:$0xff] %vm414_vm5, %v409_v23 }
 0x223   :  { %v411_v61 = vpop.permute.xlu0 %410 }
 0x224   :  { %416 = vst.msk [vmem:[#allocation11 + $0x20] sm:$0xff] %vm414_vm5, %v411_v61 }
 0x225   :  { %v473_v24 = vpop.permute.xlu1 %472 }
 0x226   :  { %479 = vst.msk [vmem:[#allocation11] sm:$0xff] %vm478_vm6, %v473_v24 }
 0x227   :  { %v475_v25 = vpop.permute.xlu0 %474 }
 0x228   :  { %480 = vst.msk [vmem:[#allocation11 + $0x20] sm:$0xff] %vm478_vm6, %v475_v25 }
 0x229   :  { %v537_v26 = vpop.permute.xlu1 %536 }
 0x22a   :  { %543 = vst.msk [vmem:[#allocation11] sm:$0xff] %vm542_vm7, %v537_v26 }
 0x22b   :  { %v539_v27 = vpop.permute.xlu0 %538 }
 0x22c   :  { %544 = vst.msk [vmem:[#allocation11 + $0x20] sm:$0xff] %vm542_vm7, %v539_v27 }
 0x22d   :  { %v601_v28 = vpop.permute.xlu1 %600 }
 0x22e   :  { %607 = vst.msk [vmem:[#allocation11] sm:$0xff] %vm606_vm8, %v601_v28 }
 0x22f   :  { %v603_v29 = vpop.permute.xlu0 %602 }
 0x230   :  { %608 = vst.msk [vmem:[#allocation11 + $0x20] sm:$0xff] %vm606_vm8, %v603_v29 }
 0x231   :  { %v665_v30 = vpop.permute.xlu1 %664 }
 0x232   :  { %671 = vst.msk [vmem:[#allocation11] sm:$0xff] %vm670_vm9, %v665_v30 }
 0x233   :  { %v667_v31 = vpop.permute.xlu0 %666 }
 0x234   :  { %672 = vst.msk [vmem:[#allocation11 + $0x20] sm:$0xff] %vm670_vm9, %v667_v31 }
 0x239   :  { %v782_v32 = vpop.permute.xlu1 %781 }
 0x23a   :  { %787 = vst.msk [vmem:[#allocation11 + $0x8] sm:$0xff] %vm286_vm3, %v782_v32 }
 0x23b   :  { %v784_v33 = vpop.permute.xlu0 %783 }
 0x23c   :  { %788 = vst.msk [vmem:[#allocation11 + $0x28] sm:$0xff] %vm286_vm3, %v784_v33 }
 0x23d   :  { %v845_v34 = vpop.permute.xlu1 %844 }
 0x23e   :  { %850 = vst.msk [vmem:[#allocation11 + $0x8] sm:$0xff] %vm350_vm4, %v845_v34 }
 0x23f   :  { %v847_v35 = vpop.permute.xlu0 %846 }
 0x240   :  { %851 = vst.msk [vmem:[#allocation11 + $0x28] sm:$0xff] %vm350_vm4, %v847_v35 }
 0x241   :  { %v908_v36 = vpop.permute.xlu1 %907 }
 0x242   :  { %913 = vst.msk [vmem:[#allocation11 + $0x8] sm:$0xff] %vm414_vm5, %v908_v36 }
 0x243   :  { %v910_v37 = vpop.permute.xlu0 %909 }
 0x244   :  { %914 = vst.msk [vmem:[#allocation11 + $0x28] sm:$0xff] %vm414_vm5, %v910_v37 }
 0x245   :  { %v971_v38 = vpop.permute.xlu1 %970 }
 0x246   :  { %976 = vst.msk [vmem:[#allocation11 + $0x8] sm:$0xff] %vm478_vm6, %v971_v38 }
 0x247   :  { %v973_v39 = vpop.permute.xlu0 %972 }
 0x248   :  { %977 = vst.msk [vmem:[#allocation11 + $0x28] sm:$0xff] %vm478_vm6, %v973_v39 }
 0x249   :  { %v1034_v40 = vpop.permute.xlu1 %1033 }
 0x24a   :  { %1039 = vst.msk [vmem:[#allocation11 + $0x8] sm:$0xff] %vm542_vm7, %v1034_v40 }
 0x24b   :  { %v1036_v41 = vpop.permute.xlu0 %1035 }
 0x24c   :  { %1040 = vst.msk [vmem:[#allocation11 + $0x28] sm:$0xff] %vm542_vm7, %v1036_v41 }
 0x24d   :  { %v1097_v42 = vpop.permute.xlu1 %1096 }
 0x24e   :  { %1102 = vst.msk [vmem:[#allocation11 + $0x8] sm:$0xff] %vm606_vm8, %v1097_v42 }
 0x24f   :  { %v1099_v43 = vpop.permute.xlu0 %1098 }
 0x250   :  { %1103 = vst.msk [vmem:[#allocation11 + $0x28] sm:$0xff] %vm606_vm8, %v1099_v43 }
 0x251   :  { %v1160_v44 = vpop.permute.xlu1 %1159 }
 0x252   :  { %1165 = vst.msk [vmem:[#allocation11 + $0x8] sm:$0xff] %vm670_vm9, %v1160_v44 }
 0x253   :  { %v1162_v45 = vpop.permute.xlu0 %1161 }
 0x254   :  { %1166 = vst.msk [vmem:[#allocation11 + $0x28] sm:$0xff] %vm670_vm9, %v1162_v45 }
 0x259   :  { %v1276_v46 = vpop.permute.xlu1 %1275 }
 0x25a   :  { %1281 = vst.msk [vmem:[#allocation11 + $0x10] sm:$0xff] %vm286_vm3, %v1276_v46 }
 0x25b   :  { %v1278_v47 = vpop.permute.xlu0 %1277 }
 0x25c   :  { %1282 = vst.msk [vmem:[#allocation11 + $0x30] sm:$0xff] %vm286_vm3, %v1278_v47 }
 0x25d   :  { %v1339_v48 = vpop.permute.xlu1 %1338 }
 0x25e   :  { %1344 = vst.msk [vmem:[#allocation11 + $0x10] sm:$0xff] %vm350_vm4, %v1339_v48 }
 0x25f   :  { %v1341_v49 = vpop.permute.xlu0 %1340 }
 0x260   :  { %1345 = vst.msk [vmem:[#allocation11 + $0x30] sm:$0xff] %vm350_vm4, %v1341_v49 }
 0x261   :  { %v1402_v50 = vpop.permute.xlu1 %1401 }
 0x262   :  { %1407 = vst.msk [vmem:[#allocation11 + $0x10] sm:$0xff] %vm414_vm5, %v1402_v50 }
 0x263   :  { %v1404_v51 = vpop.permute.xlu0 %1403 }
 0x264   :  { %1408 = vst.msk [vmem:[#allocation11 + $0x30] sm:$0xff] %vm414_vm5, %v1404_v51 }
 0x265   :  { %v1465_v52 = vpop.permute.xlu1 %1464 }
 0x266   :  { %1470 = vst.msk [vmem:[#allocation11 + $0x10] sm:$0xff] %vm478_vm6, %v1465_v52 }
 0x267   :  { %v1467_v53 = vpop.permute.xlu0 %1466 }
 0x268   :  { %1471 = vst.msk [vmem:[#allocation11 + $0x30] sm:$0xff] %vm478_vm6, %v1467_v53 }
 0x269   :  { %v1528_v54 = vpop.permute.xlu1 %1527 }
 0x26a   :  { %1533 = vst.msk [vmem:[#allocation11 + $0x10] sm:$0xff] %vm542_vm7, %v1528_v54 }
 0x26b   :  { %v1530_v55 = vpop.permute.xlu0 %1529 }
 0x26c   :  { %1534 = vst.msk [vmem:[#allocation11 + $0x30] sm:$0xff] %vm542_vm7, %v1530_v55 }
 0x26d   :  { %v1591_v57 = vpop.permute.xlu1 %1590 }
 0x26e   :  { %1596 = vst.msk [vmem:[#allocation11 + $0x10] sm:$0xff] %vm606_vm8, %v1591_v57 }
 0x26f   :  { %v1593_v58 = vpop.permute.xlu0 %1592 }
 0x270   :  { %1597 = vst.msk [vmem:[#allocation11 + $0x30] sm:$0xff] %vm606_vm8, %v1593_v58 }
 0x271   :  { %v1654_v59 = vpop.permute.xlu1 %1653 }
 0x272   :  { %1659 = vst.msk [vmem:[#allocation11 + $0x10] sm:$0xff] %vm670_vm9, %v1654_v59 }
 0x273   :  { %v1656_v60 = vpop.permute.xlu0 %1655 }
 0x274   :  { %1660 = vst.msk [vmem:[#allocation11 + $0x30] sm:$0xff] %vm670_vm9, %v1656_v60 }
 0x275   :  { %2168 = shalt.err (!%p2165_p2)
}
 0x276   :  { %s2169_s14 = scalar_lea.hbm %s2621_s5, 1024 }
 0x277   :  { %p2170_p3 = scmp.ne.s32.totalorder %s2621_s5, %s2169_s14  ;;  %p2173_p4 = scmp.lt.u32.totalorder %s2169_s14, %s2621_s5 }
 0x279   :  { %p2175_p5 = pnand %p2173_p4, %p2170_p3 }
 0x27b   :  { %2178 = shalt.err (!%p2175_p5)
}
 0x27c   :  { %s2204_s18 = smov 512  }
 0x27d   :  { %1725 = dma.vmem_to_hbm [thread:$0]  %s1720_s30, 1024, %s2621_s5, [#allocation4], %s2204_s18, %s2204_s18, %s2202_s9  }
 0x27e   :  { %2185 = dma.done.wait [#allocation4], 1024  }
 0x27f   :  { %2186 = vsyncadd [#allocation4], 4294966272 }
 0x280   :  { %1729 = vsyncpa [#allocation3], 1 }
 0x281   :  { %1730 = vsyncpa [#allocation6], 1 }
 0x282   :  { %1731 = vsyncpa [#allocation9], 1 }
 0x283   :  { %1732 = vsyncpa [#allocation4], 1 }

</bundles_post_ra>
